<compile_context>
chip_gen: v7x
topology: tpu7x:2x2x1
jax: 0.10.0
libtpu: 0.0.40
codegen_flags: <defaults>
</compile_context>

<pallas_src>
import functools

import jax
import jax.numpy as jnp
from jax.experimental import pallas as pl
from jax.experimental.pallas import tpu as pltpu

_VMEM_LIMIT = 32 * 1024 * 1024   # sized to need (<20 MiB) + headroom; < v7x physical
_LN_EPS = 1e-5                   # CLIP LayerNorm eps


def _cp(dimension_semantics):
    return pltpu.CompilerParams(
        dimension_semantics=dimension_semantics,
        vmem_limit_bytes=_VMEM_LIMIT,
    )


def _round_up(x, m):
    return ((x + m - 1) // m) * m


def _pick_tile(n, target, align):
    """Largest tile <= target that divides n and is a multiple of align, else n."""
    if n <= target:
        return n
    t = (target // align) * align
    while t >= align:
        if n % t == 0:
            return t
        t -= align
    return n


def _ln_f32(x, g, b):
    mu = jnp.mean(x, axis=-1, keepdims=True)
    var = jnp.mean(jnp.square(x - mu), axis=-1, keepdims=True)
    return (x - mu) * jax.lax.rsqrt(var + _LN_EPS) * g + b


# ----------------------------------------------------------------------------
# Pallas kernels
# ----------------------------------------------------------------------------
def _matmul_kernel(x_ref, w_ref, o_ref):
    # Plain (no-bias) matmul: bf16 operands, f32 MXU accumulate.
    o_ref[...] = jnp.dot(
        x_ref[...], w_ref[...], preferred_element_type=jnp.float32
    ).astype(o_ref.dtype)


def _layernorm_kernel(x_ref, g_ref, b_ref, o_ref):
    o_ref[...] = _ln_f32(
        x_ref[...].astype(jnp.float32), g_ref[...], b_ref[...]
    ).astype(o_ref.dtype)


def _ln_proj_kernel(x_ref, g_ref, b_ref, w_ref, o_ref):
    # ln_post fused with the (bias-free) visual projection.
    xn = _ln_f32(x_ref[...].astype(jnp.float32), g_ref[...], b_ref[...])
    o_ref[...] = jnp.dot(
        xn.astype(w_ref.dtype), w_ref[...], preferred_element_type=jnp.float32
    ).astype(o_ref.dtype)


def _attn_block_kernel(x_ref, g_ref, b_ref, wqkv_ref, bqkv_ref, wout_ref, bout_ref,
                       o_ref, xn_s, acc_s, *, dh, scale, seq_valid):
    """Fused residual attention sub-block for one (batch, head) grid step.

    grid = (B, heads); heads is the inner reduction axis (weight-streamed).
    Scratch: xn_s = ln_1(x) (bf16, computed once per batch step),
             acc_s = residual + out_bias + sum_h attn_h @ Wout_h  (f32).
    """
    h = pl.program_id(1)

    @pl.when(h == 0)
    def _():
        x = x_ref[0].astype(jnp.float32)                      # (Sp, D)
        xn_s[...] = _ln_f32(x, g_ref[...], b_ref[...]).astype(xn_s.dtype)
        acc_s[...] = x + bout_ref[...]                        # residual + out_proj bias

    # Per-head QKV projection: (Sp, D) @ (D, 3*dh) -> (Sp, 3*dh), f32 accumulate.
    qkv = jnp.dot(xn_s[...], wqkv_ref[0],
                  preferred_element_type=jnp.float32) + bqkv_ref[0]
    q = qkv[:, 0 * dh:1 * dh].astype(jnp.bfloat16)
    k = qkv[:, 1 * dh:2 * dh].astype(jnp.bfloat16)
    v = qkv[:, 2 * dh:3 * dh].astype(jnp.bfloat16)

    # scores = q @ k^T (bf16 MXU, f32 acc), scaled AFTER the dot for accuracy.
    s = jax.lax.dot_general(q, k, (((1,), (1,)), ((), ())),
                            preferred_element_type=jnp.float32)
    sp = s.shape[-1]
    kmask = jnp.where(
        jax.lax.broadcasted_iota(jnp.int32, (1, sp), 1) < seq_valid, 0.0, -1e30
    ).astype(jnp.float32)
    s = s * scale + kmask

    m = jnp.max(s, axis=-1, keepdims=True)
    p = jnp.exp(s - m)
    l = jnp.sum(p, axis=-1, keepdims=True)
    o = jnp.dot(p.astype(jnp.bfloat16), v, preferred_element_type=jnp.float32)
    o = o * pl.reciprocal(l, approx=True)                     # EUP, not VALU divide

    # Head h's contribution of the output projection (streams Wout rows too).
    acc_s[...] += jnp.dot(o.astype(jnp.bfloat16), wout_ref[0],
                          preferred_element_type=jnp.float32)

    @pl.when(h == pl.num_programs(1) - 1)
    def _():
        o_ref[0] = acc_s[...].astype(o_ref.dtype)


def _mlp_block_kernel(x_ref, g_ref, b_ref, wfc_ref, bfc_ref, wproj_ref, bproj_ref,
                      o_ref, xn_s, acc_s):
    """Fused residual MLP sub-block: ln2 -> fc -> QuickGELU -> c_proj + residual.

    grid = (M//tm, H//th); the hidden-column axis j is the inner reduction axis:
    fc_w column tiles and proj_w row tiles stream while previous tiles compute.
    The (tm, th) hidden activation never leaves VMEM/vregs.
    """
    j = pl.program_id(1)

    @pl.when(j == 0)
    def _():
        x = x_ref[...].astype(jnp.float32)                    # (tm, D)
        xn_s[...] = _ln_f32(x, g_ref[...], b_ref[...]).astype(xn_s.dtype)
        acc_s[...] = x + bproj_ref[...]                       # residual + proj bias

    hcol = jnp.dot(xn_s[...], wfc_ref[...],
                   preferred_element_type=jnp.float32) + bfc_ref[...]
    hcol = hcol * jax.nn.sigmoid(1.702 * hcol)                # CLIP QuickGELU, f32
    acc_s[...] += jnp.dot(hcol.astype(jnp.bfloat16), wproj_ref[...],
                          preferred_element_type=jnp.float32)

    @pl.when(j == pl.num_programs(1) - 1)
    def _():
        o_ref[...] = acc_s[...].astype(o_ref.dtype)


# ----------------------------------------------------------------------------
# pallas_call wrappers
# ----------------------------------------------------------------------------
def matmul(x, w, *, block_rows, block_cols, out_dtype):
    M, K = x.shape
    N = w.shape[1]
    tm = _pick_tile(M, block_rows, 8)
    tn = _pick_tile(N, block_cols, 128)
    return pl.pallas_call(
        _matmul_kernel,
        grid=(M // tm, N // tn),
        in_specs=[
            pl.BlockSpec((tm, K), lambda i, j: (i, 0)),
            pl.BlockSpec((K, tn), lambda i, j: (0, j)),   # weight streamed over j
        ],
        out_specs=pl.BlockSpec((tm, tn), lambda i, j: (i, j)),
        out_shape=jax.ShapeDtypeStruct((M, N), out_dtype),
        compiler_params=_cp(("parallel", "parallel")),
    )(x, w)


def layernorm(x, g, b, *, block_rows, out_dtype):
    M, D = x.shape
    tm = _pick_tile(M, block_rows, 8)
    return pl.pallas_call(
        _layernorm_kernel,
        grid=(M // tm,),
        in_specs=[
            pl.BlockSpec((tm, D), lambda i: (i, 0)),
            pl.BlockSpec((1, D), lambda i: (0, 0)),
            pl.BlockSpec((1, D), lambda i: (0, 0)),
        ],
        out_specs=pl.BlockSpec((tm, D), lambda i: (i, 0)),
        out_shape=jax.ShapeDtypeStruct((M, D), out_dtype),
        compiler_params=_cp(("parallel",)),
    )(x, g, b)


def ln_project(x, g, b, w, *, out_dtype):
    # Tiny: cls-token rows only (B rows).
    M, D = x.shape
    N = w.shape[1]
    return pl.pallas_call(
        _ln_proj_kernel,
        grid=(1,),
        in_specs=[
            pl.BlockSpec((M, D), lambda i: (0, 0)),
            pl.BlockSpec((1, D), lambda i: (0, 0)),
            pl.BlockSpec((1, D), lambda i: (0, 0)),
            pl.BlockSpec((D, N), lambda i: (0, 0)),
        ],
        out_specs=pl.BlockSpec((M, N), lambda i: (0, 0)),
        out_shape=jax.ShapeDtypeStruct((M, N), out_dtype),
        compiler_params=_cp(("arbitrary",)),
    )(x, g, b, w)


def attention_block(x, blk, *, heads, dh, scale, seq_valid):
    B, Sp, D = x.shape
    kern = functools.partial(_attn_block_kernel, dh=dh, scale=scale,
                             seq_valid=seq_valid)
    return pl.pallas_call(
        kern,
        grid=(B, heads),
        in_specs=[
            pl.BlockSpec((1, Sp, D), lambda b, h: (b, 0, 0)),       # residual input
            pl.BlockSpec((1, D), lambda b, h: (0, 0)),              # ln1 gamma
            pl.BlockSpec((1, D), lambda b, h: (0, 0)),              # ln1 beta
            pl.BlockSpec((1, D, 3 * dh), lambda b, h: (h, 0, 0)),   # per-head qkv W
            pl.BlockSpec((1, 1, 3 * dh), lambda b, h: (h, 0, 0)),   # per-head qkv b
            pl.BlockSpec((1, dh, D), lambda b, h: (h, 0, 0)),       # per-head out W
            pl.BlockSpec((1, D), lambda b, h: (0, 0)),              # out bias
        ],
        out_specs=pl.BlockSpec((1, Sp, D), lambda b, h: (b, 0, 0)),
        out_shape=jax.ShapeDtypeStruct((B, Sp, D), jnp.bfloat16),
        scratch_shapes=[
            pltpu.VMEM((Sp, D), jnp.bfloat16),   # ln1(x), reused across heads
            pltpu.VMEM((Sp, D), jnp.float32),    # residual + out_proj accumulator
        ],
        compiler_params=_cp(("parallel", "arbitrary")),
    )(x, blk["ln1_g"], blk["ln1_b"], blk["qkv_w_hm"], blk["qkv_b_hm"],
      blk["out_w_hm"], blk["out_b"])


def mlp_block(x, blk, *, block_rows, block_hidden):
    M, D = x.shape
    H = blk["fc_w"].shape[1]
    tm = _pick_tile(M, block_rows, 8)
    th = _pick_tile(H, block_hidden, 128)
    return pl.pallas_call(
        _mlp_block_kernel,
        grid=(M // tm, H // th),
        in_specs=[
            pl.BlockSpec((tm, D), lambda i, j: (i, 0)),     # residual input
            pl.BlockSpec((1, D), lambda i, j: (0, 0)),      # ln2 gamma
            pl.BlockSpec((1, D), lambda i, j: (0, 0)),      # ln2 beta
            pl.BlockSpec((D, th), lambda i, j: (0, j)),     # fc W column tile
            pl.BlockSpec((1, th), lambda i, j: (0, j)),     # fc bias tile
            pl.BlockSpec((th, D), lambda i, j: (j, 0)),     # proj W row tile
            pl.BlockSpec((1, D), lambda i, j: (0, 0)),      # proj bias
        ],
        out_specs=pl.BlockSpec((tm, D), lambda i, j: (i, 0)),
        out_shape=jax.ShapeDtypeStruct((M, D), jnp.bfloat16),
        scratch_shapes=[
            pltpu.VMEM((tm, D), jnp.bfloat16),   # ln2(x), reused across j
            pltpu.VMEM((tm, D), jnp.float32),    # residual + c_proj accumulator
        ],
        compiler_params=_cp(("parallel", "arbitrary")),
    )(x, blk["ln2_g"], blk["ln2_b"], blk["fc_w"], blk["fc_b"],
      blk["proj_w"], blk["proj_b"])


# ----------------------------------------------------------------------------
# Parameter layout helpers (checkpoint -> head-major kernel layout)
# ----------------------------------------------------------------------------
def _qkv_weight_head_major(w, heads, dh):
    """(D, 3D) with columns [Q|K|V] -> (heads, D, 3*dh) with per-head [q|k|v]."""
    D = w.shape[0]
    wq, wk, wv = w[:, :D], w[:, D:2 * D], w[:, 2 * D:]
    split = lambda m: m.reshape(D, heads, dh).transpose(1, 0, 2)   # (heads, D, dh)
    return jnp.concatenate([split(wq), split(wk), split(wv)], axis=-1)


def _qkv_bias_head_major(b, heads, dh):
    """(3D,) -> (heads, 1, 3*dh) with per-head [q|k|v]."""
    D = b.shape[-1] // 3
    bq, bk, bv = b[:D], b[D:2 * D], b[2 * D:]
    split = lambda v: v.reshape(heads, dh)
    return jnp.concatenate([split(bq), split(bk), split(bv)], axis=-1)[:, None, :]


# ----------------------------------------------------------------------------
# Model: scaled-down CLIP visual transformer (encode_image)
# ----------------------------------------------------------------------------
def init_params(key, cfg):
    D = cfg["width"]
    p = cfg["patch"]
    C = cfg["channels"]
    N = cfg["grid"] ** 2
    heads = cfg["heads"]
    dh = D // heads
    hidden = 4 * D
    keys = iter(jax.random.split(key, 4 + 4 * cfg["layers"]))

    def nrm(shape, dtype=jnp.bfloat16, scale=0.02):
        return (scale * jax.random.normal(next(keys), shape)).astype(dtype)

    params = {
        # Conv2d(C, D, kernel=p, stride=p, bias=False) flattened to a matmul,
        # weight laid out (C*p*p, D) matching the (C, kh, kw) patch order.
        "conv_w": nrm((C * p * p, D)),
        "class_embedding": nrm((D,), dtype=jnp.float32),
        "positional_embedding": nrm((N + 1, D), dtype=jnp.float32),
        "ln_pre_g": jnp.ones((1, D), jnp.float32),
        "ln_pre_b": jnp.zeros((1, D), jnp.float32),
        "ln_post_g": jnp.ones((1, D), jnp.float32),
        "ln_post_b": jnp.zeros((1, D), jnp.float32),
        "proj": nrm((D, cfg["out_dim"])),            # visual projection (no bias)
        "blocks": [],
    }
    for _ in range(cfg["layers"]):
        qkv_w = nrm((D, 3 * D))                       # canonical checkpoint layout
        qkv_b = jnp.zeros((3 * D,), jnp.float32)
        out_w = nrm((D, D))
        params["blocks"].append({
            "ln1_g": jnp.ones((1, D), jnp.float32),
            "ln1_b": jnp.zeros((1, D), jnp.float32),
            "qkv_w_hm": _qkv_weight_head_major(qkv_w, heads, dh),   # (heads, D, 3dh)
            "qkv_b_hm": _qkv_bias_head_major(qkv_b, heads, dh),     # (heads, 1, 3dh)
            "out_w_hm": out_w.reshape(heads, dh, D),                # (heads, dh, D)
            "out_b": jnp.zeros((1, D), jnp.float32),
            "ln2_g": jnp.ones((1, D), jnp.float32),
            "ln2_b": jnp.zeros((1, D), jnp.float32),
            "fc_w": nrm((D, hidden)),
            "fc_b": jnp.zeros((1, hidden), jnp.float32),
            "proj_w": nrm((hidden, D)),
            "proj_b": jnp.zeros((1, D), jnp.float32),
        })
    return params


def clip_encode_image(params, images, *, cfg):
    B, C, H, W = images.shape
    p = cfg["patch"]
    g = H // p
    N = g * g
    D = cfg["width"]
    heads = cfg["heads"]
    dh = D // heads
    scale = dh ** -0.5
    S = N + 1
    Sp = _round_up(S, 16)                 # lane/sublane-friendly padded sequence
    br = cfg["block_rows"]

    # ---- patch embedding (Conv2d stride=kernel=p, no bias) as a tiled matmul --
    # bf16 before the unfold transpose (halves XLA shuffle traffic).
    xp = images.astype(jnp.bfloat16).reshape(B, C, g, p, g, p)
    xp = xp.transpose(0, 2, 4, 1, 3, 5).reshape(B * N, C * p * p)  # (C, kh, kw) order
    M = B * N
    Mp = _round_up(M, 8)                  # 8-aligned rows -> unmasked sublane stores
    if Mp != M:
        xp = jnp.pad(xp, ((0, Mp - M), (0, 0)))
    x = matmul(xp, params["conv_w"], block_rows=br,
               block_cols=cfg["block_cols"], out_dtype=jnp.float32)[:M]
    x = x.reshape(B, N, D)

    # ---- class token + positional embedding + pad sequence (tiny XLA glue) ---
    cls = jnp.broadcast_to(params["class_embedding"].astype(jnp.float32), (B, 1, D))
    x = jnp.concatenate([cls, x], axis=1) + params["positional_embedding"][None]
    x = jnp.pad(x, ((0, 0), (0, Sp - S), (0, 0)))                  # (B, Sp, D)

    # ---- ln_pre (only standalone LayerNorm; residual stream is its output) ---
    x2 = layernorm(x.reshape(B * Sp, D), params["ln_pre_g"], params["ln_pre_b"],
                   block_rows=br, out_dtype=jnp.bfloat16)
    x3 = x2.reshape(B, Sp, D)

    # ---- residual attention blocks: 2 fused pallas_calls per layer ----------
    # TODO(synk): the residual stream is kept in bf16 (reference is fp16/fp32);
    # validate end-to-end tolerance against the real checkpoint.
    for blk in params["blocks"]:
        # x = x + out_proj(MHA(ln_1(x)))  (one fused kernel, heads streamed)
        x3 = attention_block(x3, blk, heads=heads, dh=dh, scale=scale, seq_valid=S)
        # x = x + c_proj(QuickGELU(c_fc(ln_2(x))))  (one fused kernel, hidden streamed)
        x3 = mlp_block(x3.reshape(B * Sp, D), blk, block_rows=br,
                       block_hidden=cfg["block_hidden"]).reshape(B, Sp, D)

    # ---- ln_post on class token fused with final projection (no bias) --------
    cls_tok = x3[:, 0, :]                                           # (B, D)
    return ln_project(cls_tok, params["ln_post_g"], params["ln_post_b"],
                      params["proj"], out_dtype=jnp.float32)        # (B, out_dim)


if __name__ == "__main__":
    # TODO(synk): real clip.load('ViT-B/32') checkpoint + preprocess (resize /
    # RGB normalize) are not reproduced here; at full scale use width=768,
    # heads=12 (dh=64), layers=12, patch=32, grid=7 (S=50 -> Sp=64), out_dim=512,
    # block_rows=64, block_cols=256, block_hidden=768.
    cfg = {
        "channels": 3,
        "patch": 8,
        "grid": 4,            # 32x32 image / patch 8 -> 16 patches (+cls = 17 -> Sp=32)
        "width": 128,
        "heads": 4,           # dh = 32
        "layers": 2,
        "out_dim": 128,       # scaled-down analogue of feat_dim=512
        "block_rows": 32,     # M = B*Sp = 128 -> 4 parallel row tiles
        "block_cols": 128,
        "block_hidden": 128,  # hidden = 512 -> 4 streamed weight column tiles
    }

    key = jax.random.PRNGKey(0)
    pkey, xkey = jax.random.split(key)
    params = init_params(pkey, cfg)

    B = 4
    H = W = cfg["patch"] * cfg["grid"]
    images = jax.random.normal(xkey, (B, cfg["channels"], H, W), dtype=jnp.float32)

    encode = jax.jit(functools.partial(clip_encode_image, cfg=cfg))
    feats = encode(params, images)
    jax.block_until_ready(feats)

    assert feats.shape == (B, cfg["out_dim"]), feats.shape
    assert bool(jnp.all(jnp.isfinite(feats)))
    print("KERNEL_OK")
</pallas_src>

<mosaic_0001>
module attributes {stable_mosaic.version = 11 : i64} {
  func.func @_matmul_kernel(%arg0: i32, %arg1: i32, %arg2: memref<32x192xbf16, #tpu.memory_space<vmem>>, %arg3: memref<192x128xbf16, #tpu.memory_space<vmem>>, %arg4: memref<32x128xf32, #tpu.memory_space<vmem>>) attributes {dimension_semantics = [#tpu.dimension_semantics<parallel>, #tpu.dimension_semantics<parallel>], iteration_bounds = array<i64: 2, 1>, scalar_prefetch = 0 : i64, scratch_operands = 0 : i64, tpu.core_type = #tpu.core_type<tc>, window_params = [{transform_indices = @transform_0, window_bounds = array<i64: 32, 192>}, {transform_indices = @transform_1, window_bounds = array<i64: 192, 128>}, {transform_indices = @transform_2, window_bounds = array<i64: 32, 128>}]} {
    %c0 = arith.constant 0 : index
    %c0_0 = arith.constant 0 : index
    %0 = vector.load %arg2[%c0, %c0_0] : memref<32x192xbf16, #tpu.memory_space<vmem>>, vector<32x192xbf16>
    %c0_1 = arith.constant 0 : index
    %c0_2 = arith.constant 0 : index
    %1 = vector.load %arg3[%c0_1, %c0_2] : memref<192x128xbf16, #tpu.memory_space<vmem>>, vector<192x128xbf16>
    %cst = arith.constant dense<0.000000e+00> : vector<32x128xf32>
    %2 = tpu.matmul %0, %1, %cst {dimension_numbers = #tpu.dot_dimension_numbers<[1], [0], [0], [1], [0, 0, 1, 1], [], []>} : vector<32x192xbf16>, vector<192x128xbf16>, vector<32x128xf32> -> vector<32x128xf32>
    %c0_3 = arith.constant 0 : index
    %c0_4 = arith.constant 0 : index
    %3 = vector.load %arg4[%c0_3, %c0_4] : memref<32x128xf32, #tpu.memory_space<vmem>>, vector<32x128xf32>
    tpu.vector_store %arg4[%c0_3, %c0_4], %2 {strides = array<i32>} : memref<32x128xf32, #tpu.memory_space<vmem>>, vector<32x128xf32>,
    return
  }
  func.func @transform_0(%arg0: i32, %arg1: i32) -> (i32, i32) {
    %c0_i32 = arith.constant 0 : i32
    %c0_i32_0 = arith.constant 0 : i32
    return %arg0, %c0_i32 : i32, i32
  }
  func.func @transform_1(%arg0: i32, %arg1: i32) -> (i32, i32) {
    %c0_i32 = arith.constant 0 : i32
    %c0_i32_0 = arith.constant 0 : i32
    return %c0_i32, %arg1 : i32, i32
  }
  func.func @transform_2(%arg0: i32, %arg1: i32) -> (i32, i32) {
    %c0_i32 = arith.constant 0 : i32
    return %arg0, %arg1 : i32, i32
  }
}

module attributes {stable_mosaic.version = 11 : i64} {
  func.func @_layernorm_kernel(%arg0: i32, %arg1: memref<32x128xf32, #tpu.memory_space<vmem>>, %arg2: memref<1x128xf32, #tpu.memory_space<vmem>>, %arg3: memref<1x128xf32, #tpu.memory_space<vmem>>, %arg4: memref<32x128xbf16, #tpu.memory_space<vmem>>) attributes {dimension_semantics = [#tpu.dimension_semantics<parallel>], iteration_bounds = array<i64: 4>, scalar_prefetch = 0 : i64, scratch_operands = 0 : i64, tpu.core_type = #tpu.core_type<tc>, window_params = [{transform_indices = @transform_0, window_bounds = array<i64: 32, 128>}, {pipeline_mode = #tpu.pipeline_mode<synchronous>, transform_indices = @transform_1, window_bounds = array<i64: 1, 128>}, {pipeline_mode = #tpu.pipeline_mode<synchronous>, transform_indices = @transform_2, window_bounds = array<i64: 1, 128>}, {transform_indices = @transform_3, window_bounds = array<i64: 32, 128>}]} {
    %c0 = arith.constant 0 : index
    %c0_0 = arith.constant 0 : index
    %0 = vector.load %arg1[%c0, %c0_0] : memref<32x128xf32, #tpu.memory_space<vmem>>, vector<32x128xf32>
    %c0_1 = arith.constant 0 : index
    %c0_2 = arith.constant 0 : index
    %1 = vector.load %arg2[%c0_1, %c0_2] : memref<1x128xf32, #tpu.memory_space<vmem>>, vector<1x128xf32>
    %c0_3 = arith.constant 0 : index
    %c0_4 = arith.constant 0 : index
    %2 = vector.load %arg3[%c0_3, %c0_4] : memref<1x128xf32, #tpu.memory_space<vmem>>, vector<1x128xf32>
    %cst = arith.constant dense<0.000000e+00> : vector<32xf32>
    %3 = vector.multi_reduction <add>, %0, %cst [1] : vector<32x128xf32> to vector<32xf32>
    %4 = vector.shape_cast %3 : vector<32xf32> to vector<32x1xf32>
    %cst_5 = arith.constant 1.280000e+02 : f32
    %5 = vector.broadcast %cst_5 : f32 to vector<32x1xf32>
    %6 = arith.divf %4, %5 : vector<32x1xf32>
    %7 = vector.broadcast %6 : vector<32x1xf32> to vector<32x128xf32>
    %8 = arith.subf %0, %7 : vector<32x128xf32>
    %9 = arith.mulf %8, %8 : vector<32x128xf32>
    %cst_6 = arith.constant dense<0.000000e+00> : vector<32xf32>
    %10 = vector.multi_reduction <add>, %9, %cst_6 [1] : vector<32x128xf32> to vector<32xf32>
    %11 = vector.shape_cast %10 : vector<32xf32> to vector<32x1xf32>
    %cst_7 = arith.constant 1.280000e+02 : f32
    %12 = vector.broadcast %cst_7 : f32 to vector<32x1xf32>
    %13 = arith.divf %11, %12 : vector<32x1xf32>
    %14 = vector.broadcast %6 : vector<32x1xf32> to vector<32x128xf32>
    %15 = arith.subf %0, %14 : vector<32x128xf32>
    %cst_8 = arith.constant 9.99999974E-6 : f32
    %16 = vector.broadcast %cst_8 : f32 to vector<32x1xf32>
    %17 = arith.addf %13, %16 : vector<32x1xf32>
    %18 = math.rsqrt %17 : vector<32x1xf32>
    %19 = vector.broadcast %18 : vector<32x1xf32> to vector<32x128xf32>
    %20 = arith.mulf %15, %19 : vector<32x128xf32>
    %21 = vector.broadcast %1 : vector<1x128xf32> to vector<32x128xf32>
    %22 = arith.mulf %20, %21 : vector<32x128xf32>
    %23 = vector.broadcast %2 : vector<1x128xf32> to vector<32x128xf32>
    %24 = arith.addf %22, %23 : vector<32x128xf32>
    %25 = arith.truncf %24 : vector<32x128xf32> to vector<32x128xbf16>
    %c0_9 = arith.constant 0 : index
    %c0_10 = arith.constant 0 : index
    %26 = vector.load %arg4[%c0_9, %c0_10] : memref<32x128xbf16, #tpu.memory_space<vmem>>, vector<32x128xbf16>
    tpu.vector_store %arg4[%c0_9, %c0_10], %25 {strides = array<i32>} : memref<32x128xbf16, #tpu.memory_space<vmem>>, vector<32x128xbf16>,
    return
  }
  func.func @transform_0(%arg0: i32) -> (i32, i32) {
    %c0_i32 = arith.constant 0 : i32
    %c0_i32_0 = arith.constant 0 : i32
    return %arg0, %c0_i32 : i32, i32
  }
  func.func @transform_1(%arg0: i32) -> (i32, i32) {
    %c0_i32 = arith.constant 0 : i32
    %c0_i32_0 = arith.constant 0 : i32
    %c0_i32_1 = arith.constant 0 : i32
    return %c0_i32, %c0_i32_0 : i32, i32
  }
  func.func @transform_2(%arg0: i32) -> (i32, i32) {
    %c0_i32 = arith.constant 0 : i32
    %c0_i32_0 = arith.constant 0 : i32
    %c0_i32_1 = arith.constant 0 : i32
    return %c0_i32, %c0_i32_0 : i32, i32
  }
  func.func @transform_3(%arg0: i32) -> (i32, i32) {
    %c0_i32 = arith.constant 0 : i32
    %c0_i32_0 = arith.constant 0 : i32
    return %arg0, %c0_i32 : i32, i32
  }
}

module attributes {stable_mosaic.version = 11 : i64} {
  func.func @_mlp_block_kernel(%arg0: i32, %arg1: i32, %arg2: memref<32x128xbf16, #tpu.memory_space<vmem>>, %arg3: memref<1x128xf32, #tpu.memory_space<vmem>>, %arg4: memref<1x128xf32, #tpu.memory_space<vmem>>, %arg5: memref<128x128xbf16, #tpu.memory_space<vmem>>, %arg6: memref<1x128xf32, #tpu.memory_space<vmem>>, %arg7: memref<128x128xbf16, #tpu.memory_space<vmem>>, %arg8: memref<1x128xf32, #tpu.memory_space<vmem>>, %arg9: memref<32x128xbf16, #tpu.memory_space<vmem>>, %arg10: memref<32x128xbf16, #tpu.memory_space<vmem>>, %arg11: memref<32x128xf32, #tpu.memory_space<vmem>>) attributes {dimension_semantics = [#tpu.dimension_semantics<parallel>, #tpu.dimension_semantics<arbitrary>], iteration_bounds = array<i64: 4, 4>, scalar_prefetch = 0 : i64, scratch_operands = 2 : i64, tpu.core_type = #tpu.core_type<tc>, window_params = [{transform_indices = @transform_0, window_bounds = array<i64: 32, 128>}, {pipeline_mode = #tpu.pipeline_mode<synchronous>, transform_indices = @transform_1, window_bounds = array<i64: 1, 128>}, {pipeline_mode = #tpu.pipeline_mode<synchronous>, transform_indices = @transform_2, window_bounds = array<i64: 1, 128>}, {transform_indices = @transform_3, window_bounds = array<i64: 128, 128>}, {transform_indices = @transform_4, window_bounds = array<i64: 1, 128>}, {transform_indices = @transform_5, window_bounds = array<i64: 128, 128>}, {pipeline_mode = #tpu.pipeline_mode<synchronous>, transform_indices = @transform_6, window_bounds = array<i64: 1, 128>}, {transform_indices = @transform_7, window_bounds = array<i64: 32, 128>}]} {
    %c0_i32 = arith.constant 0 : i32
    %0 = arith.cmpi eq, %arg1, %c0_i32 : i32
    %1 = arith.extui %0 : i1 to i32
    %c0_i32_0 = arith.constant 0 : i32
    %2 = arith.cmpi ne, %1, %c0_i32_0 : i32
    scf.if %2 {
      %c0_16 = arith.constant 0 : index
      %c0_17 = arith.constant 0 : index
      %26 = vector.load %arg2[%c0_16, %c0_17] : memref<32x128xbf16, #tpu.memory_space<vmem>>, vector<32x128xbf16>
      %27 = arith.extf %26 : vector<32x128xbf16> to vector<32x128xf32>
      %c0_18 = arith.constant 0 : index
      %c0_19 = arith.constant 0 : index
      %28 = vector.load %arg3[%c0_18, %c0_19] : memref<1x128xf32, #tpu.memory_space<vmem>>, vector<1x128xf32>
      %c0_20 = arith.constant 0 : index
      %c0_21 = arith.constant 0 : index
      %29 = vector.load %arg4[%c0_20, %c0_21] : memref<1x128xf32, #tpu.memory_space<vmem>>, vector<1x128xf32>
      %cst_22 = arith.constant dense<0.000000e+00> : vector<32xf32>
      %30 = vector.multi_reduction <add>, %27, %cst_22 [1] : vector<32x128xf32> to vector<32xf32>
      %31 = vector.shape_cast %30 : vector<32xf32> to vector<32x1xf32>
      %cst_23 = arith.constant 1.280000e+02 : f32
      %32 = vector.broadcast %cst_23 : f32 to vector<32x1xf32>
      %33 = arith.divf %31, %32 : vector<32x1xf32>
      %34 = vector.broadcast %33 : vector<32x1xf32> to vector<32x128xf32>
      %35 = arith.subf %27, %34 : vector<32x128xf32>
      %36 = arith.mulf %35, %35 : vector<32x128xf32>
      %cst_24 = arith.constant dense<0.000000e+00> : vector<32xf32>
      %37 = vector.multi_reduction <add>, %36, %cst_24 [1] : vector<32x128xf32> to vector<32xf32>
      %38 = vector.shape_cast %37 : vector<32xf32> to vector<32x1xf32>
      %cst_25 = arith.constant 1.280000e+02 : f32
      %39 = vector.broadcast %cst_25 : f32 to vector<32x1xf32>
      %40 = arith.divf %38, %39 : vector<32x1xf32>
      %41 = vector.broadcast %33 : vector<32x1xf32> to vector<32x128xf32>
      %42 = arith.subf %27, %41 : vector<32x128xf32>
      %cst_26 = arith.constant 9.99999974E-6 : f32
      %43 = vector.broadcast %cst_26 : f32 to vector<32x1xf32>
      %44 = arith.addf %40, %43 : vector<32x1xf32>
      %45 = math.rsqrt %44 : vector<32x1xf32>
      %46 = vector.broadcast %45 : vector<32x1xf32> to vector<32x128xf32>
      %47 = arith.mulf %42, %46 : vector<32x128xf32>
      %48 = vector.broadcast %28 : vector<1x128xf32> to vector<32x128xf32>
      %49 = arith.mulf %47, %48 : vector<32x128xf32>
      %50 = vector.broadcast %29 : vector<1x128xf32> to vector<32x128xf32>
      %51 = arith.addf %49, %50 : vector<32x128xf32>
      %52 = arith.truncf %51 : vector<32x128xf32> to vector<32x128xbf16>
      %c0_27 = arith.constant 0 : index
      %c0_28 = arith.constant 0 : index
      %53 = vector.load %arg10[%c0_27, %c0_28] : memref<32x128xbf16, #tpu.memory_space<vmem>>, vector<32x128xbf16>
      tpu.vector_store %arg10[%c0_27, %c0_28], %52 {strides = array<i32>} : memref<32x128xbf16, #tpu.memory_space<vmem>>, vector<32x128xbf16>,
      %c0_29 = arith.constant 0 : index
      %c0_30 = arith.constant 0 : index
      %54 = vector.load %arg8[%c0_29, %c0_30] : memref<1x128xf32, #tpu.memory_space<vmem>>, vector<1x128xf32>
      %55 = vector.broadcast %54 : vector<1x128xf32> to vector<32x128xf32>
      %56 = arith.addf %27, %55 : vector<32x128xf32>
      %c0_31 = arith.constant 0 : index
      %c0_32 = arith.constant 0 : index
      %57 = vector.load %arg11[%c0_31, %c0_32] : memref<32x128xf32, #tpu.memory_space<vmem>>, vector<32x128xf32>
      tpu.vector_store %arg11[%c0_31, %c0_32], %56 {strides = array<i32>} : memref<32x128xf32, #tpu.memory_space<vmem>>, vector<32x128xf32>,
    } else {
    }
    %c0 = arith.constant 0 : index
    %c0_1 = arith.constant 0 : index
    %3 = vector.load %arg10[%c0, %c0_1] : memref<32x128xbf16, #tpu.memory_space<vmem>>, vector<32x128xbf16>
    %c0_2 = arith.constant 0 : index
    %c0_3 = arith.constant 0 : index
    %4 = vector.load %arg5[%c0_2, %c0_3] : memref<128x128xbf16, #tpu.memory_space<vmem>>, vector<128x128xbf16>
    %cst = arith.constant dense<0.000000e+00> : vector<32x128xf32>
    %5 = tpu.matmul %3, %4, %cst {dimension_numbers = #tpu.dot_dimension_numbers<[1], [0], [0], [1], [0, 0, 1, 1], [], []>} : vector<32x128xbf16>, vector<128x128xbf16>, vector<32x128xf32> -> vector<32x128xf32>
    %c0_4 = arith.constant 0 : index
    %c0_5 = arith.constant 0 : index
    %6 = vector.load %arg6[%c0_4, %c0_5] : memref<1x128xf32, #tpu.memory_space<vmem>>, vector<1x128xf32>
    %7 = vector.broadcast %6 : vector<1x128xf32> to vector<32x128xf32>
    %8 = arith.addf %5, %7 : vector<32x128xf32>
    %cst_6 = arith.constant 1.702000e+00 : f32
    %9 = vector.broadcast %cst_6 : f32 to vector<32x128xf32>
    %10 = arith.mulf %9, %8 : vector<32x128xf32>
    %11 = arith.negf %10 : vector<32x128xf32>
    %12 = math.exp %11 : vector<32x128xf32>
    %cst_7 = arith.constant 1.000000e+00 : f32
    %13 = vector.broadcast %cst_7 : f32 to vector<32x128xf32>
    %14 = arith.addf %13, %12 : vector<32x128xf32>
    %15 = arith.divf %13, %14 : vector<32x128xf32>
    %16 = arith.mulf %8, %15 : vector<32x128xf32>
    %c0_8 = arith.constant 0 : index
    %c0_9 = arith.constant 0 : index
    %17 = vector.load %arg11[%c0_8, %c0_9] : memref<32x128xf32, #tpu.memory_space<vmem>>, vector<32x128xf32>
    %18 = arith.truncf %16 : vector<32x128xf32> to vector<32x128xbf16>
    %c0_10 = arith.constant 0 : index
    %c0_11 = arith.constant 0 : index
    %19 = vector.load %arg7[%c0_10, %c0_11] : memref<128x128xbf16, #tpu.memory_space<vmem>>, vector<128x128xbf16>
    %cst_12 = arith.constant dense<0.000000e+00> : vector<32x128xf32>
    %20 = tpu.matmul %18, %19, %cst_12 {dimension_numbers = #tpu.dot_dimension_numbers<[1], [0], [0], [1], [0, 0, 1, 1], [], []>} : vector<32x128xbf16>, vector<128x128xbf16>, vector<32x128xf32> -> vector<32x128xf32>
    %21 = arith.addf %17, %20 : vector<32x128xf32>
    %c0_13 = arith.constant 0 : index
    %c0_14 = arith.constant 0 : index
    %22 = vector.load %arg11[%c0_13, %c0_14] : memref<32x128xf32, #tpu.memory_space<vmem>>, vector<32x128xf32>
    tpu.vector_store %arg11[%c0_13, %c0_14], %21 {strides = array<i32>} : memref<32x128xf32, #tpu.memory_space<vmem>>, vector<32x128xf32>,
    %c3_i32 = arith.constant 3 : i32
    %23 = arith.cmpi eq, %arg1, %c3_i32 : i32
    %24 = arith.extui %23 : i1 to i32
    %c0_i32_15 = arith.constant 0 : i32
    %25 = arith.cmpi ne, %24, %c0_i32_15 : i32
    scf.if %25 {
      %c0_16 = arith.constant 0 : index
      %c0_17 = arith.constant 0 : index
      %26 = vector.load %arg11[%c0_16, %c0_17] : memref<32x128xf32, #tpu.memory_space<vmem>>, vector<32x128xf32>
      %27 = arith.truncf %26 : vector<32x128xf32> to vector<32x128xbf16>
      %c0_18 = arith.constant 0 : index
      %c0_19 = arith.constant 0 : index
      %28 = vector.load %arg9[%c0_18, %c0_19] : memref<32x128xbf16, #tpu.memory_space<vmem>>, vector<32x128xbf16>
      tpu.vector_store %arg9[%c0_18, %c0_19], %27 {strides = array<i32>} : memref<32x128xbf16, #tpu.memory_space<vmem>>, vector<32x128xbf16>,
    } else {
    }
    return
  }
  func.func @transform_0(%arg0: i32, %arg1: i32) -> (i32, i32) {
    %c0_i32 = arith.constant 0 : i32
    %c0_i32_0 = arith.constant 0 : i32
    return %arg0, %c0_i32 : i32, i32
  }
  func.func @transform_1(%arg0: i32, %arg1: i32) -> (i32, i32) {
    %c0_i32 = arith.constant 0 : i32
    %c0_i32_0 = arith.constant 0 : i32
    %c0_i32_1 = arith.constant 0 : i32
    return %c0_i32, %c0_i32_0 : i32, i32
  }
  func.func @transform_2(%arg0: i32, %arg1: i32) -> (i32, i32) {
    %c0_i32 = arith.constant 0 : i32
    %c0_i32_0 = arith.constant 0 : i32
    %c0_i32_1 = arith.constant 0 : i32
    return %c0_i32, %c0_i32_0 : i32, i32
  }
  func.func @transform_3(%arg0: i32, %arg1: i32) -> (i32, i32) {
    %c0_i32 = arith.constant 0 : i32
    %c0_i32_0 = arith.constant 0 : i32
    return %c0_i32, %arg1 : i32, i32
  }
  func.func @transform_4(%arg0: i32, %arg1: i32) -> (i32, i32) {
    %c0_i32 = arith.constant 0 : i32
    %c0_i32_0 = arith.constant 0 : i32
    return %c0_i32, %arg1 : i32, i32
  }
  func.func @transform_5(%arg0: i32, %arg1: i32) -> (i32, i32) {
    %c0_i32 = arith.constant 0 : i32
    %c0_i32_0 = arith.constant 0 : i32
    return %arg1, %c0_i32 : i32, i32
  }
  func.func @transform_6(%arg0: i32, %arg1: i32) -> (i32, i32) {
    %c0_i32 = arith.constant 0 : i32
    %c0_i32_0 = arith.constant 0 : i32
    %c0_i32_1 = arith.constant 0 : i32
    return %c0_i32, %c0_i32_0 : i32, i32
  }
  func.func @transform_7(%arg0: i32, %arg1: i32) -> (i32, i32) {
    %c0_i32 = arith.constant 0 : i32
    %c0_i32_0 = arith.constant 0 : i32
    return %arg0, %c0_i32 : i32, i32
  }
}

module attributes {stable_mosaic.version = 11 : i64} {
  func.func @_attn_block_kernel(%arg0: i32, %arg1: i32, %arg2: memref<1x32x128xbf16, #tpu.memory_space<vmem>>, %arg3: memref<1x128xf32, #tpu.memory_space<vmem>>, %arg4: memref<1x128xf32, #tpu.memory_space<vmem>>, %arg5: memref<1x128x96xbf16, #tpu.memory_space<vmem>>, %arg6: memref<1x1x96xf32, #tpu.memory_space<vmem>>, %arg7: memref<1x32x128xbf16, #tpu.memory_space<vmem>>, %arg8: memref<1x128xf32, #tpu.memory_space<vmem>>, %arg9: memref<1x32x128xbf16, #tpu.memory_space<vmem>>, %arg10: memref<32x128xbf16, #tpu.memory_space<vmem>>, %arg11: memref<32x128xf32, #tpu.memory_space<vmem>>) attributes {dimension_semantics = [#tpu.dimension_semantics<parallel>, #tpu.dimension_semantics<arbitrary>], iteration_bounds = array<i64: 4, 4>, scalar_prefetch = 0 : i64, scratch_operands = 2 : i64, tpu.core_type = #tpu.core_type<tc>, window_params = [{transform_indices = @transform_0, window_bounds = array<i64: 1, 32, 128>}, {pipeline_mode = #tpu.pipeline_mode<synchronous>, transform_indices = @transform_1, window_bounds = array<i64: 1, 128>}, {pipeline_mode = #tpu.pipeline_mode<synchronous>, transform_indices = @transform_2, window_bounds = array<i64: 1, 128>}, {transform_indices = @transform_3, window_bounds = array<i64: 1, 128, 96>}, {transform_indices = @transform_4, window_bounds = array<i64: 1, 1, 96>}, {transform_indices = @transform_5, window_bounds = array<i64: 1, 32, 128>}, {pipeline_mode = #tpu.pipeline_mode<synchronous>, transform_indices = @transform_6, window_bounds = array<i64: 1, 128>}, {transform_indices = @transform_7, window_bounds = array<i64: 1, 32, 128>}]} {
    %c0_i32 = arith.constant 0 : i32
    %0 = arith.cmpi eq, %arg1, %c0_i32 : i32
    %1 = arith.extui %0 : i1 to i32
    %c0_i32_0 = arith.constant 0 : i32
    %2 = arith.cmpi ne, %1, %c0_i32_0 : i32
    scf.if %2 {
      %c0_24 = arith.constant 0 : index
      %c0_25 = arith.constant 0 : index
      %c0_26 = arith.constant 0 : index
      %50 = vector.load %arg2[%c0_24, %c0_25, %c0_26] : memref<1x32x128xbf16, #tpu.memory_space<vmem>>, vector<1x32x128xbf16>
      %51 = vector.shape_cast %50 : vector<1x32x128xbf16> to vector<32x128xbf16>
      %52 = arith.extf %51 : vector<32x128xbf16> to vector<32x128xf32>
      %c0_27 = arith.constant 0 : index
      %c0_28 = arith.constant 0 : index
      %53 = vector.load %arg3[%c0_27, %c0_28] : memref<1x128xf32, #tpu.memory_space<vmem>>, vector<1x128xf32>
      %c0_29 = arith.constant 0 : index
      %c0_30 = arith.constant 0 : index
      %54 = vector.load %arg4[%c0_29, %c0_30] : memref<1x128xf32, #tpu.memory_space<vmem>>, vector<1x128xf32>
      %cst_31 = arith.constant dense<0.000000e+00> : vector<32xf32>
      %55 = vector.multi_reduction <add>, %52, %cst_31 [1] : vector<32x128xf32> to vector<32xf32>
      %56 = vector.shape_cast %55 : vector<32xf32> to vector<32x1xf32>
      %cst_32 = arith.constant 1.280000e+02 : f32
      %57 = vector.broadcast %cst_32 : f32 to vector<32x1xf32>
      %58 = arith.divf %56, %57 : vector<32x1xf32>
      %59 = vector.broadcast %58 : vector<32x1xf32> to vector<32x128xf32>
      %60 = arith.subf %52, %59 : vector<32x128xf32>
      %61 = arith.mulf %60, %60 : vector<32x128xf32>
      %cst_33 = arith.constant dense<0.000000e+00> : vector<32xf32>
      %62 = vector.multi_reduction <add>, %61, %cst_33 [1] : vector<32x128xf32> to vector<32xf32>
      %63 = vector.shape_cast %62 : vector<32xf32> to vector<32x1xf32>
      %cst_34 = arith.constant 1.280000e+02 : f32
      %64 = vector.broadcast %cst_34 : f32 to vector<32x1xf32>
      %65 = arith.divf %63, %64 : vector<32x1xf32>
      %66 = vector.broadcast %58 : vector<32x1xf32> to vector<32x128xf32>
      %67 = arith.subf %52, %66 : vector<32x128xf32>
      %cst_35 = arith.constant 9.99999974E-6 : f32
      %68 = vector.broadcast %cst_35 : f32 to vector<32x1xf32>
      %69 = arith.addf %65, %68 : vector<32x1xf32>
      %70 = math.rsqrt %69 : vector<32x1xf32>
      %71 = vector.broadcast %70 : vector<32x1xf32> to vector<32x128xf32>
      %72 = arith.mulf %67, %71 : vector<32x128xf32>
      %73 = vector.broadcast %53 : vector<1x128xf32> to vector<32x128xf32>
      %74 = arith.mulf %72, %73 : vector<32x128xf32>
      %75 = vector.broadcast %54 : vector<1x128xf32> to vector<32x128xf32>
      %76 = arith.addf %74, %75 : vector<32x128xf32>
      %77 = arith.truncf %76 : vector<32x128xf32> to vector<32x128xbf16>
      %c0_36 = arith.constant 0 : index
      %c0_37 = arith.constant 0 : index
      %78 = vector.load %arg10[%c0_36, %c0_37] : memref<32x128xbf16, #tpu.memory_space<vmem>>, vector<32x128xbf16>
      tpu.vector_store %arg10[%c0_36, %c0_37], %77 {strides = array<i32>} : memref<32x128xbf16, #tpu.memory_space<vmem>>, vector<32x128xbf16>,
      %c0_38 = arith.constant 0 : index
      %c0_39 = arith.constant 0 : index
      %79 = vector.load %arg8[%c0_38, %c0_39] : memref<1x128xf32, #tpu.memory_space<vmem>>, vector<1x128xf32>
      %80 = vector.broadcast %79 : vector<1x128xf32> to vector<32x128xf32>
      %81 = arith.addf %52, %80 : vector<32x128xf32>
      %c0_40 = arith.constant 0 : index
      %c0_41 = arith.constant 0 : index
      %82 = vector.load %arg11[%c0_40, %c0_41] : memref<32x128xf32, #tpu.memory_space<vmem>>, vector<32x128xf32>
      tpu.vector_store %arg11[%c0_40, %c0_41], %81 {strides = array<i32>} : memref<32x128xf32, #tpu.memory_space<vmem>>, vector<32x128xf32>,
    } else {
    }
    %c0 = arith.constant 0 : index
    %c0_1 = arith.constant 0 : index
    %3 = vector.load %arg10[%c0, %c0_1] : memref<32x128xbf16, #tpu.memory_space<vmem>>, vector<32x128xbf16>
    %c0_2 = arith.constant 0 : index
    %c0_3 = arith.constant 0 : index
    %c0_4 = arith.constant 0 : index
    %4 = vector.load %arg5[%c0_2, %c0_3, %c0_4] : memref<1x128x96xbf16, #tpu.memory_space<vmem>>, vector<1x128x96xbf16>
    %5 = vector.shape_cast %4 : vector<1x128x96xbf16> to vector<128x96xbf16>
    %cst = arith.constant dense<0.000000e+00> : vector<32x96xf32>
    %6 = tpu.matmul %3, %5, %cst {dimension_numbers = #tpu.dot_dimension_numbers<[1], [0], [0], [1], [0, 0, 1, 1], [], []>} : vector<32x128xbf16>, vector<128x96xbf16>, vector<32x96xf32> -> vector<32x96xf32>
    %c0_5 = arith.constant 0 : index
    %c0_6 = arith.constant 0 : index
    %c0_7 = arith.constant 0 : index
    %7 = vector.load %arg6[%c0_5, %c0_6, %c0_7] : memref<1x1x96xf32, #tpu.memory_space<vmem>>, vector<1x1x96xf32>
    %8 = vector.shape_cast %7 : vector<1x1x96xf32> to vector<1x96xf32>
    %9 = vector.broadcast %8 : vector<1x96xf32> to vector<32x96xf32>
    %10 = arith.addf %6, %9 : vector<32x96xf32>
    %11 = vector.extract_strided_slice %10 {offsets = [0, 0], sizes = [32, 32], strides = [1, 1]} : vector<32x96xf32> to vector<32x32xf32>
    %12 = arith.truncf %11 : vector<32x32xf32> to vector<32x32xbf16>
    %13 = vector.extract_strided_slice %10 {offsets = [0, 32], sizes = [32, 32], strides = [1, 1]} : vector<32x96xf32> to vector<32x32xf32>
    %14 = arith.truncf %13 : vector<32x32xf32> to vector<32x32xbf16>
    %15 = vector.extract_strided_slice %10 {offsets = [0, 64], sizes = [32, 32], strides = [1, 1]} : vector<32x96xf32> to vector<32x32xf32>
    %16 = arith.truncf %15 : vector<32x32xf32> to vector<32x32xbf16>
    %cst_8 = arith.constant dense<0.000000e+00> : vector<32x32xf32>
    %17 = tpu.matmul %12, %14, %cst_8 {dimension_numbers = #tpu.dot_dimension_numbers<[1], [1], [0], [0], [0, 0, 1, 0], [], []>} : vector<32x32xbf16>, vector<32x32xbf16>, vector<32x32xf32> -> vector<32x32xf32>
    %18 = tpu.iota {dimensions = array<i32: 1>} : vector<1x32xi32>
    %c17_i32 = arith.constant 17 : i32
    %19 = vector.broadcast %c17_i32 : i32 to vector<1x32xi32>
    %20 = arith.cmpi slt, %18, %19 : vector<1x32xi32>
    %cst_9 = arith.constant 0.000000e+00 : f32
    %cst_10 = arith.constant -1.000000e+30 : f32
    %21 = vector.broadcast %cst_9 : f32 to vector<1x32xf32>
    %22 = vector.broadcast %cst_10 : f32 to vector<1x32xf32>
    %23 = arith.select %20, %21, %22 : vector<1x32xi1>, vector<1x32xf32>
    %cst_11 = arith.constant 0.176776692 : f32
    %24 = vector.broadcast %cst_11 : f32 to vector<32x32xf32>
    %25 = arith.mulf %17, %24 : vector<32x32xf32>
    %26 = vector.broadcast %23 : vector<1x32xf32> to vector<32x32xf32>
    %27 = arith.addf %25, %26 : vector<32x32xf32>
    %cst_12 = arith.constant dense<0xFF800000> : vector<32xf32>
    %28 = vector.multi_reduction <maximumf>, %27, %cst_12 [1] : vector<32x32xf32> to vector<32xf32>
    %29 = vector.shape_cast %28 : vector<32xf32> to vector<32x1xf32>
    %30 = vector.broadcast %29 : vector<32x1xf32> to vector<32x32xf32>
    %31 = arith.subf %27, %30 : vector<32x32xf32>
    %32 = math.exp %31 : vector<32x32xf32>
    %cst_13 = arith.constant dense<0.000000e+00> : vector<32xf32>
    %33 = vector.multi_reduction <add>, %32, %cst_13 [1] : vector<32x32xf32> to vector<32xf32>
    %34 = vector.shape_cast %33 : vector<32xf32> to vector<32x1xf32>
    %35 = arith.truncf %32 : vector<32x32xf32> to vector<32x32xbf16>
    %cst_14 = arith.constant dense<0.000000e+00> : vector<32x32xf32>
    %36 = tpu.matmul %35, %16, %cst_14 {dimension_numbers = #tpu.dot_dimension_numbers<[1], [0], [0], [1], [0, 0, 1, 1], [], []>} : vector<32x32xbf16>, vector<32x32xbf16>, vector<32x32xf32> -> vector<32x32xf32>
    %37 = tpu.reciprocal %34 {approx = true} : vector<32x1xf32> -> vector<32x1xf32>
    %38 = vector.broadcast %37 : vector<32x1xf32> to vector<32x32xf32>
    %39 = arith.mulf %36, %38 : vector<32x32xf32>
    %c0_15 = arith.constant 0 : index
    %c0_16 = arith.constant 0 : index
    %40 = vector.load %arg11[%c0_15, %c0_16] : memref<32x128xf32, #tpu.memory_space<vmem>>, vector<32x128xf32>
    %41 = arith.truncf %39 : vector<32x32xf32> to vector<32x32xbf16>
    %c0_17 = arith.constant 0 : index
    %c0_18 = arith.constant 0 : index
    %c0_19 = arith.constant 0 : index
    %42 = vector.load %arg7[%c0_17, %c0_18, %c0_19] : memref<1x32x128xbf16, #tpu.memory_space<vmem>>, vector<1x32x128xbf16>
    %43 = vector.shape_cast %42 : vector<1x32x128xbf16> to vector<32x128xbf16>
    %cst_20 = arith.constant dense<0.000000e+00> : vector<32x128xf32>
    %44 = tpu.matmul %41, %43, %cst_20 {dimension_numbers = #tpu.dot_dimension_numbers<[1], [0], [0], [1], [0, 0, 1, 1], [], []>} : vector<32x32xbf16>, vector<32x128xbf16>, vector<32x128xf32> -> vector<32x128xf32>
    %45 = arith.addf %40, %44 : vector<32x128xf32>
    %c0_21 = arith.constant 0 : index
    %c0_22 = arith.constant 0 : index
    %46 = vector.load %arg11[%c0_21, %c0_22] : memref<32x128xf32, #tpu.memory_space<vmem>>, vector<32x128xf32>
    tpu.vector_store %arg11[%c0_21, %c0_22], %45 {strides = array<i32>} : memref<32x128xf32, #tpu.memory_space<vmem>>, vector<32x128xf32>,
    %c3_i32 = arith.constant 3 : i32
    %47 = arith.cmpi eq, %arg1, %c3_i32 : i32
    %48 = arith.extui %47 : i1 to i32
    %c0_i32_23 = arith.constant 0 : i32
    %49 = arith.cmpi ne, %48, %c0_i32_23 : i32
    scf.if %49 {
      %c0_24 = arith.constant 0 : index
      %c0_25 = arith.constant 0 : index
      %50 = vector.load %arg11[%c0_24, %c0_25] : memref<32x128xf32, #tpu.memory_space<vmem>>, vector<32x128xf32>
      %51 = arith.truncf %50 : vector<32x128xf32> to vector<32x128xbf16>
      %c0_26 = arith.constant 0 : index
      %c0_27 = arith.constant 0 : index
      %c0_28 = arith.constant 0 : index
      %52 = vector.load %arg9[%c0_26, %c0_27, %c0_28] : memref<1x32x128xbf16, #tpu.memory_space<vmem>>, vector<1x32x128xbf16>
      %53 = vector.shape_cast %52 : vector<1x32x128xbf16> to vector<32x128xbf16>
      %54 = vector.shape_cast %51 : vector<32x128xbf16> to vector<1x32x128xbf16>
      tpu.vector_store %arg9[%c0_26, %c0_27, %c0_28], %54 {strides = array<i32>} : memref<1x32x128xbf16, #tpu.memory_space<vmem>>, vector<1x32x128xbf16>,
    } else {
    }
    return
  }
  func.func @transform_0(%arg0: i32, %arg1: i32) -> (i32, i32, i32) {
    %c0_i32 = arith.constant 0 : i32
    %c0_i32_0 = arith.constant 0 : i32
    %c0_i32_1 = arith.constant 0 : i32
    return %arg0, %c0_i32, %c0_i32_0 : i32, i32, i32
  }
  func.func @transform_1(%arg0: i32, %arg1: i32) -> (i32, i32) {
    %c0_i32 = arith.constant 0 : i32
    %c0_i32_0 = arith.constant 0 : i32
    %c0_i32_1 = arith.constant 0 : i32
    return %c0_i32, %c0_i32_0 : i32, i32
  }
  func.func @transform_2(%arg0: i32, %arg1: i32) -> (i32, i32) {
    %c0_i32 = arith.constant 0 : i32
    %c0_i32_0 = arith.constant 0 : i32
    %c0_i32_1 = arith.constant 0 : i32
    return %c0_i32, %c0_i32_0 : i32, i32
  }
  func.func @transform_3(%arg0: i32, %arg1: i32) -> (i32, i32, i32) {
    %c0_i32 = arith.constant 0 : i32
    %c0_i32_0 = arith.constant 0 : i32
    %c0_i32_1 = arith.constant 0 : i32
    return %arg1, %c0_i32, %c0_i32_0 : i32, i32, i32
  }
  func.func @transform_4(%arg0: i32, %arg1: i32) -> (i32, i32, i32) {
    %c0_i32 = arith.constant 0 : i32
    %c0_i32_0 = arith.constant 0 : i32
    %c0_i32_1 = arith.constant 0 : i32
    return %arg1, %c0_i32, %c0_i32_0 : i32, i32, i32
  }
  func.func @transform_5(%arg0: i32, %arg1: i32) -> (i32, i32, i32) {
    %c0_i32 = arith.constant 0 : i32
    %c0_i32_0 = arith.constant 0 : i32
    %c0_i32_1 = arith.constant 0 : i32
    return %arg1, %c0_i32, %c0_i32_0 : i32, i32, i32
  }
  func.func @transform_6(%arg0: i32, %arg1: i32) -> (i32, i32) {
    %c0_i32 = arith.constant 0 : i32
    %c0_i32_0 = arith.constant 0 : i32
    %c0_i32_1 = arith.constant 0 : i32
    return %c0_i32, %c0_i32_0 : i32, i32
  }
  func.func @transform_7(%arg0: i32, %arg1: i32) -> (i32, i32, i32) {
    %c0_i32 = arith.constant 0 : i32
    %c0_i32_0 = arith.constant 0 : i32
    %c0_i32_1 = arith.constant 0 : i32
    return %arg0, %c0_i32, %c0_i32_0 : i32, i32, i32
  }
}

module attributes {stable_mosaic.version = 11 : i64} {
  func.func @_ln_proj_kernel(%arg0: i32, %arg1: memref<4x128xbf16, #tpu.memory_space<vmem>>, %arg2: memref<1x128xf32, #tpu.memory_space<vmem>>, %arg3: memref<1x128xf32, #tpu.memory_space<vmem>>, %arg4: memref<128x128xbf16, #tpu.memory_space<vmem>>, %arg5: memref<4x128xf32, #tpu.memory_space<vmem>>) attributes {dimension_semantics = [#tpu.dimension_semantics<arbitrary>], iteration_bounds = array<i64: 1>, scalar_prefetch = 0 : i64, scratch_operands = 0 : i64, tpu.core_type = #tpu.core_type<tc>, window_params = [{pipeline_mode = #tpu.pipeline_mode<synchronous>, transform_indices = @transform_0, window_bounds = array<i64: 4, 128>}, {pipeline_mode = #tpu.pipeline_mode<synchronous>, transform_indices = @transform_1, window_bounds = array<i64: 1, 128>}, {pipeline_mode = #tpu.pipeline_mode<synchronous>, transform_indices = @transform_2, window_bounds = array<i64: 1, 128>}, {pipeline_mode = #tpu.pipeline_mode<synchronous>, transform_indices = @transform_3, window_bounds = array<i64: 128, 128>}, {pipeline_mode = #tpu.pipeline_mode<synchronous>, transform_indices = @transform_4, window_bounds = array<i64: 4, 128>}]} {
    %c0 = arith.constant 0 : index
    %c0_0 = arith.constant 0 : index
    %0 = vector.load %arg1[%c0, %c0_0] : memref<4x128xbf16, #tpu.memory_space<vmem>>, vector<4x128xbf16>
    %1 = arith.extf %0 : vector<4x128xbf16> to vector<4x128xf32>
    %c0_1 = arith.constant 0 : index
    %c0_2 = arith.constant 0 : index
    %2 = vector.load %arg2[%c0_1, %c0_2] : memref<1x128xf32, #tpu.memory_space<vmem>>, vector<1x128xf32>
    %c0_3 = arith.constant 0 : index
    %c0_4 = arith.constant 0 : index
    %3 = vector.load %arg3[%c0_3, %c0_4] : memref<1x128xf32, #tpu.memory_space<vmem>>, vector<1x128xf32>
    %cst = arith.constant dense<0.000000e+00> : vector<4xf32>
    %4 = vector.multi_reduction <add>, %1, %cst [1] : vector<4x128xf32> to vector<4xf32>
    %5 = vector.shape_cast %4 : vector<4xf32> to vector<4x1xf32>
    %cst_5 = arith.constant 1.280000e+02 : f32
    %6 = vector.broadcast %cst_5 : f32 to vector<4x1xf32>
    %7 = arith.divf %5, %6 : vector<4x1xf32>
    %8 = vector.broadcast %7 : vector<4x1xf32> to vector<4x128xf32>
    %9 = arith.subf %1, %8 : vector<4x128xf32>
    %10 = arith.mulf %9, %9 : vector<4x128xf32>
    %cst_6 = arith.constant dense<0.000000e+00> : vector<4xf32>
    %11 = vector.multi_reduction <add>, %10, %cst_6 [1] : vector<4x128xf32> to vector<4xf32>
    %12 = vector.shape_cast %11 : vector<4xf32> to vector<4x1xf32>
    %cst_7 = arith.constant 1.280000e+02 : f32
    %13 = vector.broadcast %cst_7 : f32 to vector<4x1xf32>
    %14 = arith.divf %12, %13 : vector<4x1xf32>
    %15 = vector.broadcast %7 : vector<4x1xf32> to vector<4x128xf32>
    %16 = arith.subf %1, %15 : vector<4x128xf32>
    %cst_8 = arith.constant 9.99999974E-6 : f32
    %17 = vector.broadcast %cst_8 : f32 to vector<4x1xf32>
    %18 = arith.addf %14, %17 : vector<4x1xf32>
    %19 = math.rsqrt %18 : vector<4x1xf32>
    %20 = vector.broadcast %19 : vector<4x1xf32> to vector<4x128xf32>
    %21 = arith.mulf %16, %20 : vector<4x128xf32>
    %22 = vector.broadcast %2 : vector<1x128xf32> to vector<4x128xf32>
    %23 = arith.mulf %21, %22 : vector<4x128xf32>
    %24 = vector.broadcast %3 : vector<1x128xf32> to vector<4x128xf32>
    %25 = arith.addf %23, %24 : vector<4x128xf32>
    %26 = arith.truncf %25 : vector<4x128xf32> to vector<4x128xbf16>
    %c0_9 = arith.constant 0 : index
    %c0_10 = arith.constant 0 : index
    %27 = vector.load %arg4[%c0_9, %c0_10] : memref<128x128xbf16, #tpu.memory_space<vmem>>, vector<128x128xbf16>
    %cst_11 = arith.constant dense<0.000000e+00> : vector<4x128xf32>
    %28 = tpu.matmul %26, %27, %cst_11 {dimension_numbers = #tpu.dot_dimension_numbers<[1], [0], [0], [1], [0, 0, 1, 1], [], []>} : vector<4x128xbf16>, vector<128x128xbf16>, vector<4x128xf32> -> vector<4x128xf32>
    %c0_12 = arith.constant 0 : index
    %c0_13 = arith.constant 0 : index
    %29 = vector.load %arg5[%c0_12, %c0_13] : memref<4x128xf32, #tpu.memory_space<vmem>>, vector<4x128xf32>
    tpu.vector_store %arg5[%c0_12, %c0_13], %28 {strides = array<i32>} : memref<4x128xf32, #tpu.memory_space<vmem>>, vector<4x128xf32>,
    return
  }
  func.func @transform_0(%arg0: i32) -> (i32, i32) {
    %c0_i32 = arith.constant 0 : i32
    %c0_i32_0 = arith.constant 0 : i32
    %c0_i32_1 = arith.constant 0 : i32
    return %c0_i32, %c0_i32_0 : i32, i32
  }
  func.func @transform_1(%arg0: i32) -> (i32, i32) {
    %c0_i32 = arith.constant 0 : i32
    %c0_i32_0 = arith.constant 0 : i32
    %c0_i32_1 = arith.constant 0 : i32
    return %c0_i32, %c0_i32_0 : i32, i32
  }
  func.func @transform_2(%arg0: i32) -> (i32, i32) {
    %c0_i32 = arith.constant 0 : i32
    %c0_i32_0 = arith.constant 0 : i32
    %c0_i32_1 = arith.constant 0 : i32
    return %c0_i32, %c0_i32_0 : i32, i32
  }
  func.func @transform_3(%arg0: i32) -> (i32, i32) {
    %c0_i32 = arith.constant 0 : i32
    %c0_i32_0 = arith.constant 0 : i32
    %c0_i32_1 = arith.constant 0 : i32
    return %c0_i32, %c0_i32_0 : i32, i32
  }
  func.func @transform_4(%arg0: i32) -> (i32, i32) {
    %c0_i32 = arith.constant 0 : i32
    %c0_i32_0 = arith.constant 0 : i32
    %c0_i32_1 = arith.constant 0 : i32
    return %c0_i32, %c0_i32_0 : i32, i32
  }
}

</mosaic_0001>

<bundles_post_ra>
// kernel: clip_encode_image.8
= control target key start
LH: loop header
LB: loop body
LE: loop exit
PB: predicated region body
PF: predicated region fallthrough
CT: control target
= control target key end

     0   :  { %s397_s12 = smov 0   ;;  %s424_s0 = inlined_call_operand.vmem [shape: f32[128,128], index: 0, kind: input, shape index: {}]   ;;  %s425_s1 = inlined_call_operand.vmem [shape: f32[1,128], index: 1, kind: input, shape index: {}]   ;;  %s426_s2 = inlined_call_operand.vmem [shape: f32[1,128], index: 2, kind: input, shape index: {}]   ;;  %s427_s3 = inlined_call_operand.vmem [shape: bf16[128,128], index: 3, kind: output, shape index: {}]  }
   0x1 LB: > { %s321_s13 = sadd.s32 4294967295, %s375_s12   ;;  %p325_p0 = scmp.ge.s32.totalorder %s375_s12, 1  ;;  %s375_s12 = sphi %s397_s12, %s13_s12  }
   0x2   : > { %p138_p1 = scmp.lt.s32.totalorder %s375_s12, 5 }
   0x4   : > { %p139_p2 = pnand %p325_p0, %p138_p1 }
   0x5   : > { %s326_s14 = sshll.u32 (!%p139_p2), %s321_s13, 2  ;;  %v330_v34 = vld [vmem:[%s425_s1] ss:$0 sm:$0xff] (!%p139_p2) }
   0x6   : > { %142 = sbr.rel (%p139_p2) target bundleno = 339 (0x153), region = 32  ;;  %p163_p3 = scmp.lt.s32.totalorder (!%p139_p2), %s326_s14, 15  ;;  %v331_v39 = vld [vmem:[%s426_s2] ss:$0 sm:$0xff] (!%p139_p2) }
   0xd   : > { %s429_s14 = smov (!%p163_p3, %s326_s14), 15 }
   0xe   : > { %s327_s15 = sshll.u32 %s429_s14, 3  ;;  %s329_s23 = sshll.u32 %s429_s14, 2 }
   0xf   : > { %s166_s18 = scalar_lea.vmem %s424_s0, %s327_s15  ;;  %s172_s26 = scalar_lea.vmem %s427_s3, %s329_s23 }
  0x10   : > { %v174_v0 = vld [vmem:[%s166_s18] sm:$0xff]  ;;  %v176_v1 = vld [vmem:[%s166_s18 + $0x10] sm:$0xff]  ;;  %v175_v2 = vld [vmem:[%s166_s18 + $0x8] sm:$0xff] }
  0x11   : > { %180 = vadd.xlane.f32.xlu0 %v174_v0  ;;  %184 = vadd.xlane.f32.xlu1 %v176_v1  ;;  %v177_v3 = vld [vmem:[%s166_s18 + $0x18] sm:$0xff] }
  0x15   : > { %182 = vadd.xlane.f32.xlu0 %v175_v2  ;;  %186 = vadd.xlane.f32.xlu1 %v177_v3 }
  0x9e   : > { %v181_v4 = vpop.xlane.xlu0 %180  ;;  %v185_v5 = vpop.xlane.xlu1 %184 }
  0x9f   : > { %v189_v6 = vmul.f32 0.0078125, %v181_v4  ;;  %v191_v7 = vmul.f32 0.0078125, %v185_v5 }
  0xa1   : > { %v193_v8 = vsub.f32 %v174_v0, %v189_v6  ;;  %v195_v9 = vsub.f32 %v176_v1, %v191_v7 }
  0xa2   : > { %v183_v10 = vpop.xlane.xlu0 %182  ;;  %v187_v11 = vpop.xlane.xlu1 %186 }
  0xa3   : > { %v190_v12 = vmul.f32 0.0078125, %v183_v10  ;;  %v197_v13 = vmul.f32 %v193_v8, %v193_v8  ;;  %v192_v14 = vmul.f32 0.0078125, %v187_v11  ;;  %v199_v17 = vmul.f32 %v195_v9, %v195_v9 }
  0xa5   : > { %v194_v15 = vsub.f32 %v175_v2, %v190_v12  ;;  %201 = vadd.xlane.f32.xlu0 %v197_v13  ;;  %v196_v16 = vsub.f32 %v177_v3, %v192_v14 }
  0xa7   : > { %v198_v18 = vmul.f32 %v194_v15, %v194_v15  ;;  %v200_v19 = vmul.f32 %v196_v16, %v196_v16 }
  0xa9   : > { %205 = vadd.xlane.f32.xlu0 %v199_v17  ;;  %203 = vadd.xlane.f32.xlu1 %v198_v18 }
  0xad   : > { %207 = vadd.xlane.f32.xlu1 %v200_v19 }
 0x132   : > { %v202_v20 = vpop.xlane.xlu0 %201 }
 0x133   : > { %v209_v21 = vmul.f32 0.0078125, %v202_v20 }
 0x135   : > { %v213_v22 = vadd.f32 1e-05, %v209_v21 }
 0x136   : > { %v204_v23 = vpop.xlane.xlu1 %203  ;;  %v206_v24 = vpop.xlane.xlu0 %205 }
 0x137   : > { %361 = vrsqrt.f32 %v213_v22  ;;  %v210_v25 = vmul.f32 0.0078125, %v204_v23  ;;  %v211_v26 = vmul.f32 0.0078125, %v206_v24 }
 0x139   : > { %v214_v27 = vadd.f32 1e-05, %v210_v25  ;;  %v215_v28 = vadd.f32 1e-05, %v211_v26 }
 0x13a   : > { %v208_v29 = vpop.xlane.xlu1 %207 }
 0x13b   : > { %363 = vrsqrt.f32 %v214_v27  ;;  %v212_v30 = vmul.f32 0.0078125, %v208_v29 }
 0x13c   : > { %365 = vrsqrt.f32 %v215_v28 }
 0x13d   : > { %v216_v31 = vadd.f32 1e-05, %v212_v30 }
 0x13f   : > { %367 = vrsqrt.f32 %v216_v31 }
 0x141   : > { %v362_v32 = vpop.eup %361 }
 0x142   : > { %v221_v33 = vmul.f32 %v362_v32, %v193_v8 }
 0x144   : > { %v231_v37 = vmul.f32 %v330_v34, %v221_v33 }
 0x145   : > { %v364_v35 = vpop.eup %363 }
 0x146   : > { %v366_v36 = vpop.eup %365  ;;  %v222_v38 = vmul.f32 %v364_v35, %v194_v15  ;;  %v241_v43 = vadd.f32 %v331_v39, %v231_v37 }
 0x147   : > { %v223_v40 = vmul.f32 %v366_v36, %v195_v9 }
 0x148   : > { %v232_v41 = vmul.f32 %v330_v34, %v222_v38 }
 0x149   : > { %v368_v42 = vpop.eup %367  ;;  %v233_v45 = vmul.f32 %v330_v34, %v223_v40 }
 0x14a   : > { %v242_v44 = vadd.f32 %v331_v39, %v232_v41  ;;  %v224_v46 = vmul.f32 %v368_v42, %v196_v16 }
 0x14b   : > { %v243_v49 = vadd.f32 %v331_v39, %v233_v45 }
 0x14c   : > { %v345_v47 = vpack.c.bf16 %v242_v44, %v241_v43  ;;  %v234_v48 = vmul.f32 %v330_v34, %v224_v46 }
 0x14e   : > { %346 = vst [vmem:[%s172_s26] sm:$0xff] %v345_v47   ;;  %v244_v50 = vadd.f32 %v331_v39, %v234_v48 }
 0x150   : > { %v350_v51 = vpack.c.bf16 %v244_v50, %v243_v49 }
 0x152   : > { %352 = vst [vmem:[%s172_s26 + $0x8] sm:$0xff] %v350_v51  }
 0x153 PF: > { %s13_s12 = sadd.s32 1, %s375_s12  }
 0x154   : > { %p10_p4 = scmp.ge.s32.totalorder %s13_s12, 6  }
 0x156   :  { %12 = sbr.rel (!%p10_p4) target bundleno = 1 (0x1), region = 62 }

// kernel: clip_encode_image.7
= control target key start
LH: loop header
LB: loop body
LE: loop exit
PB: predicated region body
PF: predicated region fallthrough
CT: control target
= control target key end

     0   :  { %s595_s9 = smov 0   ;;  %s597_s10 = smov 0   ;;  %s701_s0 = inlined_call_operand.vmem [shape: bf16[64,192], index: 0, kind: input, shape index: {}]   ;;  %s702_s1 = inlined_call_operand.vmem [shape: bf16[192,128], index: 1, kind: input, shape index: {}]   ;;  %s703_s2 = inlined_call_operand.vmem [shape: f32[64,128], index: 2, kind: output, shape index: {}]  }
   0x1   :  { %s599_s11 = smov 0  }
   0x2 LB: > { %s24_s12 = sadd.s32 1, %s573_s10  ;;  %p461_p0 = scmp.ge.s32.totalorder %s577_s11, 1  ;;  %s577_s11 = sphi %s599_s11, %s12_s11   ;;  %s573_s10 = sphi %s597_s10, %s705_s10   ;;  %s569_s9 = sphi %s595_s9, %s704_s9  }
   0x3   : > { %p26_p1 = scmp.ge.s32.totalorder %s24_s12, 2  ;;  %p137_p2 = scmp.lt.s32.totalorder %s577_s11, 3 }
   0x5   : > { %s707_s12 = smov (%p26_p1, %s24_s12), 0  ;;  %p138_p3 = pnand %p461_p0, %p137_p2 }
   0x6   : > { %v537_v0 = vld [vmem:[%s702_s1] sm:$0xff] (!%p138_p3)   ;;  %v579_v1 = vmov (!%p138_p3), 0   ;;  %s462_s15 = sshll.u32 (!%p138_p3), %s569_s9, 2  ;;  %v538_v2 = vld [vmem:[%s702_s1 + $0x8] sm:$0xff] (!%p138_p3)   ;;  %v539_v3 = vld [vmem:[%s702_s1 + $0x10] sm:$0xff] (!%p138_p3)   ;;  %vm306_vm0 = vcmask (!%p138_p3), 523264  }
   0x7   : > { %141 = sbr.rel (%p138_p3) target bundleno = 270 (0x10e), region = 28  ;;  %313 = vmatprep.subr.bf16.mxu0 (!%p138_p3), %v579_v1  ;;  %488 = vmatprep.subr.bf16.mxu1 (!%p138_p3), %v579_v1  ;;  %p168_p4 = scmp.lt.s32.totalorder (!%p138_p3), %s462_s15, 7  ;;  %v540_v4 = vld [vmem:[%s702_s1 + $0x18] sm:$0xff] (!%p138_p3)   ;;  %v541_v6 = vld [vmem:[%s702_s1 + $0x20] sm:$0xff] (!%p138_p3)   ;;  %v542_v8 = vld [vmem:[%s702_s1 + $0x28] sm:$0xff] (!%p138_p3)  }
   0x8   : > { %314 = vmatpush1.bf16.msra.mxu0 (!%p138_p3), %v537_v0  ;;  %500 = vmatpush1.bf16.msra.mxu1 (!%p138_p3), %v537_v0  ;;  %v543_v9 = vld [vmem:[%s702_s1 + $0x30] sm:$0xff] (!%p138_p3)   ;;  %v544_v10 = vld [vmem:[%s702_s1 + $0x38] sm:$0xff] (!%p138_p3)   ;;  %v545_v11 = vld [vmem:[%s702_s1 + $0x40] sm:$0xff] (!%p138_p3)  }
   0x9   : > { %315 = vmatprep.subr.bf16.mxu0 (!%p138_p3), %v579_v1  ;;  %489 = vmatprep.subr.bf16.mxu1 (!%p138_p3), %v579_v1  ;;  %v546_v12 = vld [vmem:[%s702_s1 + $0x48] sm:$0xff] (!%p138_p3)   ;;  %v547_v13 = vld [vmem:[%s702_s1 + $0x50] sm:$0xff] (!%p138_p3)   ;;  %v548_v14 = vld [vmem:[%s702_s1 + $0x58] sm:$0xff] (!%p138_p3)  }
   0xc   : > { %316 = vmatpush1.bf16.msra.mxu0 (!%p138_p3), %v538_v2  ;;  %501 = vmatpush1.bf16.msra.mxu1 (!%p138_p3), %v538_v2 }
   0xd   : > { %317 = vmatprep.subr.bf16.mxu0 (!%p138_p3), %v579_v1  ;;  %490 = vmatprep.subr.bf16.mxu1 (!%p138_p3), %v579_v1 }
   0xe   : > { %s709_s15 = smov (!%p168_p4, %s462_s15), 7 }
   0xf   : > { %s487_s20 = sshll.u32 %s709_s15, 3 }
  0x10   : > { %318 = vmatpush1.bf16.msra.mxu0 %v539_v3  ;;  %502 = vmatpush1.bf16.msra.mxu1 %v539_v3  ;;  %s639_s25 = scalar_lea.vmem %s701_s0, %s487_s20  ;;  %s185_s21 = scalar_lea.vmem %s703_s2, %s487_s20 }
  0x11   : > { %319 = vmatprep.subr.bf16.mxu0 %v579_v1  ;;  %491 = vmatprep.subr.bf16.mxu1 %v579_v1  ;;  %v551_v5 = vld [vmem:[%s639_s25 + $0x4] ss:$8 sps:$4 sm:$0xff]   ;;  %v554_v7 = vld [vmem:[%s639_s25 + $0x14] ss:$8 sps:$4 sm:$0xff]   ;;  %v549_v15 = vld [vmem:[%s639_s25] ss:$8 sps:$4 sm:$0xff]  }
  0x12   : > { %483 = vmatprep.mubr.msk.bf16.mxu0 %vm306_vm0, %v551_v5  ;;  %484 = vmatprep.mubr.msk.bf16.mxu1 %vm306_vm0, %v554_v7  ;;  %v552_v16 = vld [vmem:[%s639_s25 + $0x10] ss:$8 sps:$4 sm:$0xff]  }
  0x14   : > { %320 = vmatpush1.bf16.msra.mxu0 %v540_v4  ;;  %503 = vmatpush1.bf16.msra.mxu1 %v540_v4 }
  0x15   : > { %321 = vmatprep.subr.bf16.mxu0 %v579_v1  ;;  %492 = vmatprep.subr.bf16.mxu1 %v579_v1 }
  0x18   : > { %322 = vmatpush1.bf16.msra.mxu0 %v541_v6  ;;  %504 = vmatpush1.bf16.msra.mxu1 %v541_v6 }
  0x19   : > { %323 = vmatprep.subr.bf16.mxu0 %v579_v1  ;;  %493 = vmatprep.subr.bf16.mxu1 %v579_v1 }
  0x1c   : > { %324 = vmatpush1.bf16.msra.mxu0 %v542_v8  ;;  %505 = vmatpush1.bf16.msra.mxu1 %v542_v8 }
  0x1d   : > { %325 = vmatprep.subr.bf16.mxu0 %v579_v1  ;;  %494 = vmatprep.subr.bf16.mxu1 %v579_v1 }
  0x20   : > { %326 = vmatpush1.bf16.msra.mxu0 %v543_v9  ;;  %506 = vmatpush1.bf16.msra.mxu1 %v543_v9 }
  0x21   : > { %327 = vmatprep.subr.bf16.mxu0 %v579_v1  ;;  %495 = vmatprep.subr.bf16.mxu1 %v579_v1 }
  0x24   : > { %328 = vmatpush1.bf16.msra.mxu0 %v544_v10  ;;  %507 = vmatpush1.bf16.msra.mxu1 %v544_v10 }
  0x25   : > { %329 = vmatprep.subr.bf16.mxu0 %v579_v1  ;;  %496 = vmatprep.subr.bf16.mxu1 %v579_v1 }
  0x28   : > { %330 = vmatpush1.bf16.msra.mxu0 %v545_v11  ;;  %508 = vmatpush1.bf16.msra.mxu1 %v545_v11 }
  0x29   : > { %331 = vmatprep.subr.bf16.mxu0 %v579_v1  ;;  %497 = vmatprep.subr.bf16.mxu1 %v579_v1 }
  0x2c   : > { %332 = vmatpush1.bf16.msra.mxu0 %v546_v12  ;;  %509 = vmatpush1.bf16.msra.mxu1 %v546_v12 }
  0x2d   : > { %333 = vmatprep.subr.bf16.mxu0 %v579_v1  ;;  %498 = vmatprep.subr.bf16.mxu1 %v579_v1 }
  0x30   : > { %334 = vmatpush1.bf16.msra.mxu0 %v547_v13  ;;  %510 = vmatpush1.bf16.msra.mxu1 %v547_v13 }
  0x31   : > { %335 = vmatprep.subr.bf16.mxu0 %v579_v1  ;;  %499 = vmatprep.subr.bf16.mxu1 %v579_v1 }
  0x34   : > { %336 = vmatpush1.bf16.msra.mxu0 %v548_v14  ;;  %511 = vmatpush1.bf16.msra.mxu1 %v548_v14 }
  0x37   : > { %346 = vmatmul.mubr.bf16.vlgmr.msra.gmra.mrb[0].mxu0 %v549_v15  ;;  %354 = vmatmul.mubr.bf16.vlgmr.msra.gmra.mrb[0].mxu1 %v552_v16 }
 0x10a   : > { %v347_v17 = vpop.f32.mrb[0].mxu0  ;;  %v355_v18 = vpop.f32.mrb[0].mxu1 }
 0x10b   : > { %362 = vst [vmem:[%s185_s21] sm:$0xff] %v347_v17  ;;  %v349_v19 = vpop.f32.mrb[1].mxu0  ;;  %v357_v20 = vpop.f32.mrb[1].mxu1  ;;  %364 = vst [vmem:[%s185_s21 + $0x10] sm:$0xff] %v355_v18 }
 0x10c   : > { %v350_v21 = vpop.f32.mrb[2].mxu0  ;;  %v358_v22 = vpop.f32.mrb[2].mxu1 }
 0x10d   : > { %363 = vst [vmem:[%s185_s21 + $0x8] sm:$0xff] %v350_v21  ;;  %v352_v23 = vpop.f32.mrb[3].mxu0  ;;  %v360_v24 = vpop.f32.mrb[3].mxu1  ;;  %365 = vst [vmem:[%s185_s21 + $0x18] sm:$0xff] %v358_v22 }
 0x10e PF: > { %s12_s11 = sadd.s32 1, %s577_s11   ;;  %s704_s9 = smov %s573_s10 }
 0x10f   : > { %p9_p5 = scmp.ge.s32.totalorder %s12_s11, 4   ;;  %s705_s10 = smov %s707_s12 }
 0x111   :  { %11 = sbr.rel (!%p9_p5) target bundleno = 2 (0x2), region = 61 }

// kernel: clip_encode_image.10
= control target key start
LH: loop header
LB: loop body
LE: loop exit
PB: predicated region body
PF: predicated region fallthrough
CT: control target
= control target key end

     0   :  { %s1446_s0 = inlined_call_operand.vmem [shape: bf16[128,128], index: 0, kind: input, shape index: {}]   ;;  %s1447_s1 = inlined_call_operand.vmem [shape: f32[1,128], index: 1, kind: input, shape index: {}]   ;;  %s1448_s2 = inlined_call_operand.vmem [shape: f32[1,128], index: 2, kind: input, shape index: {}]   ;;  %s1449_s3 = inlined_call_operand.vmem [shape: bf16[128,512], index: 3, kind: input, shape index: {}]   ;;  %s1450_s4 = inlined_call_operand.vmem [shape: f32[1,512], index: 4, kind: input, shape index: {}]   ;;  %s1451_s5 = inlined_call_operand.vmem [shape: bf16[512,128], index: 5, kind: input, shape index: {}]   ;;  %s1452_s6 = inlined_call_operand.vmem [shape: f32[1,128], index: 6, kind: input, shape index: {}]   ;;  %s1453_s7 = inlined_call_operand.vmem [shape: bf16[128,128], index: 7, kind: output, shape index: {}]  }
   0x1   :  { %1455 = sst [smem:[#allocation7_spill]] %s1449_s3 }
   0x2   :  { %s1288_s24 = smov 0   ;;  %s1290_s25 = smov 0  }
   0x3   :  { %s1292_s26 = smov 0   ;;  %s1294_s27 = smov 0  }
   0x4   :  { %s1296_s28 = smov 0   ;;  %s1298_s29 = smov 0  }
   0x5   :  { %s1300_s30 = smov 0  }
   0x6 LB: > { %s26_s8 = sadd.s32 1, %s1238_s28  ;;  %s29_s9 = sadd.s32 1, %s1242_s29  ;;  %s1246_s30 = sphi %s1300_s30, %s17_s30   ;;  %s1242_s29 = sphi %s1298_s29, %s1466_s29   ;;  %s1238_s28 = sphi %s1296_s28, %s1465_s28   ;;  %s1234_s27 = sphi %s1294_s27, %s1464_s27   ;;  %s1230_s26 = sphi %s1292_s26, %s1463_s26   ;;  %s1226_s25 = sphi %s1290_s25, %s1462_s25   ;;  %s1222_s24 = sphi %s1288_s24, %s1461_s24  }
   0x7   : > { %p27_p0 = scmp.ge.s32.totalorder %s26_s8, 4  ;;  %s104_s10 = sadd.s32 1, %s1226_s25 }
   0x8   : > { %p111_p1 = scmp.ne.s32.totalorder %s1226_s25, %s1222_s24  ;;  %p112_p2 = scmp.eq.s32.totalorder %s1246_s30, 0 }
   0x9   : > { %s1468_s8 = smov (%p27_p0, %s26_s8), 0  ;;  %s1470_s9 = smov (!%p27_p0, %s29_s9), %s1242_s29 }
   0xa   : > { %1456 = sst [smem:[#allocation5_spill]] %s1468_s8  ;;  %s101_s11 = ssub.s32 %s1238_s28, %s1468_s8 }
   0xb   : > { %p113_p3 = por %p112_p2, %p111_p1  ;;  %p31_p4 = scmp.ge.s32.totalorder %s1470_s9, 4 }
   0xc   : > { %p102_p5 = scmp.eq.s32.totalorder %s101_s11, 0  ;;  %p969_p6 = scmp.ge.s32.totalorder %s1246_s30, 16 }
   0xd   : > { %s1472_s9 = smov (%p31_p4, %s1470_s9), 0 }
   0xe   : > { %1457 = sst [smem:[#allocation6_spill]] %s1472_s9  ;;  %245 = sbr.rel (%p969_p6) target bundleno = 42 (0x2a), region = 28 }
   0xf   : > { %s1337_s12 = scalar_select %p102_p5, %s1226_s25, %s104_s10  }
  0x15   : > { %257 = sbr.rel (!%p113_p3) target bundleno = 42 (0x2a), region = 36  ;;  %s259_s13 = sand.u32 (%p113_p3), 1, %s1226_s25  }
  0x16   : > { %s971_s14 = sshll.u32 (%p113_p3), %s1238_s28, 2  ;;  %s970_s15 = sshll.u32 (%p113_p3), %s259_s13, 6 }
  0x17   : > { %s1458_s3 = sld [smem:[#allocation7_spill]] (%p113_p3)  ;;  %s261_s19 = scalar_lea.vmem (%p113_p3), [#allocation4], %s970_s15 }
  0x1d   : > { %s1345_s18 = scalar_lea.vmem %s1458_s3, %s971_s14 }
  0x1e   : > { %v279_v0 = vld [vmem:[%s1345_s18] sm:$0xf]  ;;  %v281_v1 = vld [vmem:[%s1345_s18 + $0x10] sm:$0xf] }
  0x1f   : > { %280 = vst [vmem:[%s261_s19] sm:$0xf] %v279_v0  ;;  %282 = vst [vmem:[%s261_s19 + $0x4] sm:$0xf] %v281_v1  ;;  %v283_v2 = vld [vmem:[%s1345_s18 + $0x20] sm:$0xf] }
  0x20   : > { %v285_v3 = vld [vmem:[%s1345_s18 + $0x30] sm:$0xf]  ;;  %v287_v4 = vld [vmem:[%s1345_s18 + $0x40] sm:$0xf]  ;;  %284 = vst [vmem:[%s261_s19 + $0x8] sm:$0xf] %v283_v2 }
  0x21   : > { %286 = vst [vmem:[%s261_s19 + $0xc] sm:$0xf] %v285_v3  ;;  %288 = vst [vmem:[%s261_s19 + $0x10] sm:$0xf] %v287_v4  ;;  %v289_v5 = vld [vmem:[%s1345_s18 + $0x50] sm:$0xf] }
  0x22   : > { %v291_v6 = vld [vmem:[%s1345_s18 + $0x60] sm:$0xf]  ;;  %v293_v7 = vld [vmem:[%s1345_s18 + $0x70] sm:$0xf]  ;;  %290 = vst [vmem:[%s261_s19 + $0x14] sm:$0xf] %v289_v5 }
  0x23   : > { %292 = vst [vmem:[%s261_s19 + $0x18] sm:$0xf] %v291_v6  ;;  %294 = vst [vmem:[%s261_s19 + $0x1c] sm:$0xf] %v293_v7  ;;  %v295_v8 = vld [vmem:[%s1345_s18 + $0x80] sm:$0xf] }
  0x24   : > { %v297_v9 = vld [vmem:[%s1345_s18 + $0x90] sm:$0xf]  ;;  %v299_v10 = vld [vmem:[%s1345_s18 + $0xa0] sm:$0xf]  ;;  %296 = vst [vmem:[%s261_s19 + $0x20] sm:$0xf] %v295_v8 }
  0x25   : > { %298 = vst [vmem:[%s261_s19 + $0x24] sm:$0xf] %v297_v9  ;;  %300 = vst [vmem:[%s261_s19 + $0x28] sm:$0xf] %v299_v10  ;;  %v301_v11 = vld [vmem:[%s1345_s18 + $0xb0] sm:$0xf] }
  0x26   : > { %v303_v12 = vld [vmem:[%s1345_s18 + $0xc0] sm:$0xf]  ;;  %v305_v13 = vld [vmem:[%s1345_s18 + $0xd0] sm:$0xf]  ;;  %302 = vst [vmem:[%s261_s19 + $0x2c] sm:$0xf] %v301_v11 }
  0x27   : > { %304 = vst [vmem:[%s261_s19 + $0x30] sm:$0xf] %v303_v12  ;;  %306 = vst [vmem:[%s261_s19 + $0x34] sm:$0xf] %v305_v13  ;;  %v307_v14 = vld [vmem:[%s1345_s18 + $0xe0] sm:$0xf] }
  0x28   : > { %v309_v15 = vld [vmem:[%s1345_s18 + $0xf0] sm:$0xf]  ;;  %308 = vst [vmem:[%s261_s19 + $0x38] sm:$0xf] %v307_v14 }
  0x29   : > { %310 = vst [vmem:[%s261_s19 + $0x3c] sm:$0xf] %v309_v15 }
  0x2a PF: > { %p972_p7 = scmp.ge.s32.totalorder %s1246_s30, 1  ;;  %p379_p8 = scmp.lt.s32.totalorder %s1246_s30, 17 }
  0x2c   : > { %p380_p9 = pnand %p972_p7, %p379_p8 }
  0x2d   : > { %s386_s20 = sand.u32 (!%p380_p9), 1, %s1222_s24   ;;  %s974_s21 = sshll.u32 (!%p380_p9), %s1234_s27, 2 }
  0x2e   : > { %383 = sbr.rel (%p380_p9) target bundleno = 893 (0x37d), region = 85  ;;  %s973_s22 = sshll.u32 (!%p380_p9), %s386_s20, 6 }
  0x2f   : > { %p431_p10 = scmp.lt.s32.totalorder (!%p380_p9), %s974_s21, 15  ;;  %p436_p11 = scmp.lt.s32.totalorder (!%p380_p9), %s1230_s26, 3 }
  0x30   : > { %s976_s11 = sshll.u32 (!%p380_p9), %s1230_s26, 4  ;;  %s1389_s8 = scalar_lea.vmem (!%p380_p9), [#allocation4], %s973_s22 }
  0x31   : > { %p440_p12 = scmp.lt.s32.totalorder (!%p380_p9), %s976_s11, 63  ;;  %p980_p13 = scmp.ne.s32.totalorder (!%p380_p9), %s1230_s26, 0 }
  0x35   : > { %s1474_s21 = smov (!%p431_p10, %s974_s21), 15  ;;  %s1476_s11 = smov (!%p440_p12, %s976_s11), 63 }
  0x36   : > { %s1369_s23 = scalar_select %p436_p11, %s1230_s26, 3 }
  0x37   : > { %s975_s10 = sshll.u32 %s1474_s21, 2  ;;  %s977_s20 = sshll.u32 %s1476_s11, 2  ;;  %v983_v17 = vld [vmem:[%s1452_s6] ss:$0 sm:$0xff] (!%p980_p13) }
  0x38   : > { %s434_s15 = scalar_lea.vmem %s1446_s0, %s975_s10  ;;  %s438_s18 = scalar_lea.vmem %s1450_s4, %s1369_s23  ;;  %v981_v57 = vld [vmem:[%s1447_s1] ss:$0 sm:$0xff] (!%p980_p13) }
  0x39   : > { %s1382_s19 = scalar_lea.vmem %s1453_s7, %s975_s10  ;;  %s1387_s21 = scalar_lea.vmem %s1451_s5, %s977_s20  ;;  %v1017_v16 = vld [vmem:[%s434_s15] sm:$0xff] (!%p980_p13)   ;;  %v1034_v18 = vld [vmem:[%s434_s15 + $0x8] sm:$0xff] (!%p980_p13)  }
  0x3a   : > { %455 = sbr.rel (%p980_p13) target bundleno = 382 (0x17e), region = 93  ;;  %v1018_v19 = vunpack.c.l.bf16 (!%p980_p13), %v1017_v16  ;;  %v1022_v20 = vunpack.c.l.bf16 (!%p980_p13), %v1034_v18  ;;  %v1019_v21 = vunpack.c.h.bf16 (!%p980_p13), %v1017_v16  ;;  %v1023_v22 = vunpack.c.h.bf16 (!%p980_p13), %v1034_v18  ;;  %v982_v62 = vld [vmem:[%s1448_s2] ss:$0 sm:$0xff] (!%p980_p13) }
  0x3c   : > { %466 = vadd.xlane.f32.xlu0 (!%p980_p13), %v1018_v19  ;;  %v542_v23 = vadd.f32 (!%p980_p13), %v1018_v19, %v983_v17  ;;  %470 = vadd.xlane.f32.xlu1 (!%p980_p13), %v1022_v20  ;;  %v544_v24 = vadd.f32 (!%p980_p13), %v1022_v20, %v983_v17  ;;  %v543_v25 = vadd.f32 (!%p980_p13), %v1019_v21, %v983_v17 }
  0x3d   : > { %v545_v26 = vadd.f32 (!%p980_p13), %v1023_v22, %v983_v17 }
  0x3e   : > { %546 = vst [vmem:[#allocation3] sm:$0xff] (!%p980_p13), %v542_v23  ;;  %548 = vst [vmem:[#allocation3 + $0x10] sm:$0xff] (!%p980_p13), %v544_v24 }
  0x3f   : > { %547 = vst [vmem:[#allocation3 + $0x8] sm:$0xff] (!%p980_p13), %v543_v25  ;;  %549 = vst [vmem:[#allocation3 + $0x18] sm:$0xff] (!%p980_p13), %v545_v26 }
  0x40   : > { %468 = vadd.xlane.f32.xlu0 (!%p980_p13), %v1019_v21  ;;  %472 = vadd.xlane.f32.xlu1 (!%p980_p13), %v1023_v22 }
  0xc9   : > { %v467_v27 = vpop.xlane.xlu0 %466  ;;  %v471_v28 = vpop.xlane.xlu1 %470 }
  0xca   : > { %v475_v29 = vmul.f32 0.0078125, %v467_v27  ;;  %v477_v30 = vmul.f32 0.0078125, %v471_v28 }
  0xcc   : > { %v479_v31 = vsub.f32 %v1018_v19, %v475_v29  ;;  %v481_v32 = vsub.f32 %v1022_v20, %v477_v30 }
  0xcd   : > { %v469_v33 = vpop.xlane.xlu0 %468  ;;  %v473_v34 = vpop.xlane.xlu1 %472 }
  0xce   : > { %v476_v35 = vmul.f32 0.0078125, %v469_v33  ;;  %v483_v36 = vmul.f32 %v479_v31, %v479_v31  ;;  %v478_v37 = vmul.f32 0.0078125, %v473_v34  ;;  %v485_v40 = vmul.f32 %v481_v32, %v481_v32 }
  0xd0   : > { %v480_v38 = vsub.f32 %v1019_v21, %v476_v35  ;;  %487 = vadd.xlane.f32.xlu0 %v483_v36  ;;  %v482_v39 = vsub.f32 %v1023_v22, %v478_v37 }
  0xd2   : > { %v484_v41 = vmul.f32 %v480_v38, %v480_v38  ;;  %v486_v42 = vmul.f32 %v482_v39, %v482_v39 }
  0xd4   : > { %491 = vadd.xlane.f32.xlu0 %v485_v40  ;;  %489 = vadd.xlane.f32.xlu1 %v484_v41 }
  0xd8   : > { %493 = vadd.xlane.f32.xlu1 %v486_v42 }
 0x15d   : > { %v488_v43 = vpop.xlane.xlu0 %487 }
 0x15e   : > { %v495_v44 = vmul.f32 0.0078125, %v488_v43 }
 0x160   : > { %v499_v45 = vadd.f32 1e-05, %v495_v44 }
 0x161   : > { %v490_v46 = vpop.xlane.xlu1 %489  ;;  %v492_v47 = vpop.xlane.xlu0 %491 }
 0x162   : > { %1152 = vrsqrt.f32 %v499_v45  ;;  %v496_v48 = vmul.f32 0.0078125, %v490_v46  ;;  %v497_v49 = vmul.f32 0.0078125, %v492_v47 }
 0x164   : > { %v500_v50 = vadd.f32 1e-05, %v496_v48  ;;  %v501_v51 = vadd.f32 1e-05, %v497_v49 }
 0x165   : > { %v494_v52 = vpop.xlane.xlu1 %493 }
 0x166   : > { %1154 = vrsqrt.f32 %v500_v50  ;;  %v498_v53 = vmul.f32 0.0078125, %v494_v52 }
 0x167   : > { %1156 = vrsqrt.f32 %v501_v51 }
 0x168   : > { %v502_v54 = vadd.f32 1e-05, %v498_v53 }
 0x16a   : > { %1158 = vrsqrt.f32 %v502_v54 }
 0x16c   : > { %v1153_v55 = vpop.eup %1152 }
 0x16d   : > { %v507_v56 = vmul.f32 %v1153_v55, %v479_v31 }
 0x16f   : > { %v517_v60 = vmul.f32 %v981_v57, %v507_v56 }
 0x170   : > { %v1155_v58 = vpop.eup %1154 }
 0x171   : > { %v1157_v59 = vpop.eup %1156  ;;  %v508_v61 = vmul.f32 %v1155_v58, %v480_v38  ;;  %v527_v2 = vadd.f32 %v982_v62, %v517_v60 }
 0x172   : > { %v509_v63 = vmul.f32 %v1157_v59, %v481_v32 }
 0x173   : > { %v518_v0 = vmul.f32 %v981_v57, %v508_v61 }
 0x174   : > { %v1159_v1 = vpop.eup %1158  ;;  %v519_v4 = vmul.f32 %v981_v57, %v509_v63 }
 0x175   : > { %v528_v3 = vadd.f32 %v982_v62, %v518_v0  ;;  %v510_v5 = vmul.f32 %v1159_v1, %v482_v39 }
 0x176   : > { %v529_v8 = vadd.f32 %v982_v62, %v519_v4 }
 0x177   : > { %v531_v6 = vpack.c.bf16 %v528_v3, %v527_v2  ;;  %v520_v7 = vmul.f32 %v981_v57, %v510_v5 }
 0x179   : > { %533 = vst [vmem:[#allocation2] sm:$0xff] %v531_v6  ;;  %v530_v9 = vadd.f32 %v982_v62, %v520_v7 }
 0x17b   : > { %v532_v10 = vpack.c.bf16 %v530_v9, %v529_v8 }
 0x17d   : > { %534 = vst [vmem:[#allocation2 + $0x8] sm:$0xff] %v532_v10 }
 0x17e PF: > { %v1160_v11 = vld [vmem:[%s1389_s8] sm:$0xff]   ;;  %v1161_v12 = vld [vmem:[%s1389_s8 + $0x8] sm:$0xff]   ;;  %v1162_v13 = vld [vmem:[%s1389_s8 + $0x10] sm:$0xff]   ;;  %p1005_p0 = scmp.ne.s32.totalorder %s1230_s26, 3 }
 0x17f   : > { %1056 = vmatprep.subr.bf16.mxu0 %v1160_v11  ;;  %v1163_v14 = vld [vmem:[%s1389_s8 + $0x18] sm:$0xff]   ;;  %v1164_v16 = vld [vmem:[%s1389_s8 + $0x20] sm:$0xff]   ;;  %v1165_v17 = vld [vmem:[%s1389_s8 + $0x28] sm:$0xff]  }
 0x180   : > { %1057 = vmatpush3.bf16.msra.mxu0 %v1160_v11  ;;  %v550_v15 = vld [vmem:[#allocation2] sm:$0xff]  ;;  %v1167_v19 = vld [vmem:[%s1389_s8 + $0x38] sm:$0xff]   ;;  %v1170_v23 = vld [vmem:[%s1387_s21 + $0x10] sm:$0xff]  }
 0x181   : > { %1058 = vmatprep.subr.bf16.mxu0 %v1161_v12  ;;  %1072 = vmatprep.mubr.bf16.mxu0 %v550_v15  ;;  %v1166_v18 = vld [vmem:[%s1389_s8 + $0x30] sm:$0xff]   ;;  %v1169_v22 = vld [vmem:[%s1387_s21 + $0x8] sm:$0xff]   ;;  %v1171_v24 = vld [vmem:[%s1387_s21 + $0x18] sm:$0xff]  }
 0x182   : > { %v1168_v21 = vld [vmem:[%s1387_s21] sm:$0xff]   ;;  %v1173_v26 = vld [vmem:[%s1387_s21 + $0x28] sm:$0xff]   ;;  %v1174_v27 = vld [vmem:[%s1387_s21 + $0x30] sm:$0xff]  }
 0x183   : > { %1076 = vmatprep.subr.bf16.mxu1 %v1168_v21  ;;  %v1172_v25 = vld [vmem:[%s1387_s21 + $0x20] sm:$0xff]   ;;  %v1175_v28 = vld [vmem:[%s1387_s21 + $0x38] sm:$0xff]   ;;  %v704_v1 = vld [vmem:[#allocation3] sm:$0xff] }
 0x184   : > { %1059 = vmatpush3.bf16.msra.mxu0 %v1161_v12  ;;  %v551_v20 = vld [vmem:[#allocation2 + $0x8] sm:$0xff]  ;;  %1077 = vmatpush3.bf16.msra.mxu1 %v1168_v21  ;;  %v984_v29 = vld [vmem:[%s438_s18] ss:$0 sm:$0xff]  ;;  %v705_v6 = vld [vmem:[#allocation3 + $0x8] sm:$0xff] }
 0x185   : > { %1060 = vmatprep.subr.bf16.mxu0 %v1162_v13  ;;  %1078 = vmatprep.subr.bf16.mxu1 %v1169_v22  ;;  %v706_v0 = vld [vmem:[#allocation3 + $0x10] sm:$0xff]  ;;  %v707_v3 = vld [vmem:[#allocation3 + $0x18] sm:$0xff] }
 0x188   : > { %1061 = vmatpush3.bf16.msra.mxu0 %v1162_v13  ;;  %1079 = vmatpush3.bf16.msra.mxu1 %v1169_v22 }
 0x189   : > { %1062 = vmatprep.subr.bf16.mxu0 %v1163_v14  ;;  %1080 = vmatprep.subr.bf16.mxu1 %v1170_v23 }
 0x18c   : > { %1063 = vmatpush3.bf16.msra.mxu0 %v1163_v14  ;;  %1081 = vmatpush3.bf16.msra.mxu1 %v1170_v23 }
 0x18d   : > { %1064 = vmatprep.subr.bf16.mxu0 %v1164_v16  ;;  %1082 = vmatprep.subr.bf16.mxu1 %v1171_v24 }
 0x190   : > { %1065 = vmatpush3.bf16.msra.mxu0 %v1164_v16  ;;  %1083 = vmatpush3.bf16.msra.mxu1 %v1171_v24 }
 0x191   : > { %1066 = vmatprep.subr.bf16.mxu0 %v1165_v17  ;;  %1084 = vmatprep.subr.bf16.mxu1 %v1172_v25 }
 0x194   : > { %1067 = vmatpush3.bf16.msra.mxu0 %v1165_v17  ;;  %1085 = vmatpush3.bf16.msra.mxu1 %v1172_v25 }
 0x195   : > { %1068 = vmatprep.subr.bf16.mxu0 %v1166_v18  ;;  %1086 = vmatprep.subr.bf16.mxu1 %v1173_v26 }
 0x198   : > { %1069 = vmatpush3.bf16.msra.mxu0 %v1166_v18  ;;  %1087 = vmatpush3.bf16.msra.mxu1 %v1173_v26 }
 0x199   : > { %1070 = vmatprep.subr.bf16.mxu0 %v1167_v19  ;;  %1088 = vmatprep.subr.bf16.mxu1 %v1174_v27 }
 0x19c   : > { %1071 = vmatpush3.bf16.msra.mxu0 %v1167_v19  ;;  %1089 = vmatpush3.bf16.msra.mxu1 %v1174_v27 }
 0x19d   : > { %1090 = vmatprep.subr.bf16.mxu1 %v1175_v28 }
 0x19f   : > { %1073 = vmatmul.mubr.bf16.vlgmr.msra.gmra.mrb[0].mxu0 %v551_v20 }
 0x1a0   : > { %1091 = vmatpush3.bf16.msra.mxu1 %v1175_v28 }
 0x272   : > { %v1074_v30 = vpop.f32.mrb[0].mxu0 }
 0x273   : > { %v666_v31 = vadd.f32 %v1074_v30, %v984_v29  ;;  %v657_v32 = vpop.f32.mrb[1].mxu0 }
 0x274   : > { %v658_v33 = vadd.f32 %v984_v29, %v657_v32  ;;  %v1075_v34 = vpop.f32.mrb[2].mxu0 }
 0x275   : > { %v995_v35 = vmul.f32 -1.702, %v666_v31  ;;  %v669_v36 = vadd.f32 %v1075_v34, %v984_v29  ;;  %v660_v37 = vpop.f32.mrb[3].mxu0 }
 0x276   : > { %v993_v38 = vmul.f32 -1.702, %v658_v33  ;;  %v661_v39 = vadd.f32 %v984_v29, %v660_v37 }
 0x277   : > { %v684_v40 = vmul.f32 1.442695, %v995_v35  ;;  %v996_v41 = vmul.f32 -1.702, %v669_v36 }
 0x278   : > { %v680_v42 = vmul.f32 1.442695, %v993_v38  ;;  %v994_v43 = vmul.f32 -1.702, %v661_v39 }
 0x279   : > { %1176 = vpow2.f32 %v684_v40  ;;  %v686_v44 = vmul.f32 1.442695, %v996_v41 }
 0x27a   : > { %1178 = vpow2.f32 %v680_v42  ;;  %v682_v45 = vmul.f32 1.442695, %v994_v43 }
 0x27b   : > { %1180 = vpow2.f32 %v686_v44 }
 0x27c   : > { %1182 = vpow2.f32 %v682_v45 }
 0x283   : > { %v1177_v46 = vpop.eup %1176 }
 0x284   : > { %v1179_v47 = vpop.eup %1178  ;;  %v690_v48 = vadd.f32 1.0, %v1177_v46 }
 0x285   : > { %v1181_v49 = vpop.eup %1180  ;;  %v688_v50 = vadd.f32 1.0, %v1179_v47 }
 0x286   : > { %v1183_v51 = vpop.eup %1182  ;;  %1184 = vrcp.f32 %v690_v48  ;;  %v691_v52 = vadd.f32 1.0, %v1181_v49 }
 0x287   : > { %1186 = vrcp.f32 %v688_v50  ;;  %v689_v53 = vadd.f32 1.0, %v1183_v51 }
 0x288   : > { %1188 = vrcp.f32 %v691_v52 }
 0x289   : > { %1190 = vrcp.f32 %v689_v53 }
 0x290   : > { %v1185_v54 = vpop.eup %1184 }
 0x291   : > { %v1187_v55 = vpop.eup %1186  ;;  %v702_v58 = vmul.f32 %v1185_v54, %v666_v31 }
 0x292   : > { %v1189_v56 = vpop.eup %1188  ;;  %v700_v60 = vmul.f32 %v1187_v55, %v658_v33 }
 0x293   : > { %v1191_v57 = vpop.eup %1190  ;;  %v703_v59 = vmul.f32 %v1189_v56, %v669_v36 }
 0x294   : > { %v701_v61 = vmul.f32 %v1191_v57, %v661_v39 }
 0x295   : > { %v709_v62 = vpack.c.bf16 %v703_v59, %v702_v58 }
 0x296   : > { %v708_v63 = vpack.c.bf16 %v701_v61, %v700_v60 }
 0x298   : > { %1092 = vmatprep.mubr.bf16.mxu1 %v708_v63 }
 0x299   : > { %1093 = vmatmul.mubr.bf16.vlgmr.msra.gmra.mrb[0].mxu1 %v709_v62 }
 0x36c   : > { %v1094_v2 = vpop.f32.mrb[0].mxu1  ;;  %834 = sbr.rel (%p1005_p0) target bundleno = 893 (0x37d), region = 97 }
 0x36d   : > { %v825_v4 = vadd.f32 %v1094_v2, %v706_v0  ;;  %v808_v5 = vpop.f32.mrb[1].mxu1 }
 0x36e   : > { %v823_v7 = vadd.f32 %v808_v5, %v704_v1  ;;  %v1095_v8 = vpop.f32.mrb[2].mxu1 }
 0x36f   : > { %829 = vst [vmem:[#allocation3 + $0x10] sm:$0xff] %v825_v4  ;;  %v826_v9 = vadd.f32 %v1095_v8, %v707_v3  ;;  %v811_v10 = vpop.f32.mrb[3].mxu1 }
 0x370   : > { %827 = vst [vmem:[#allocation3] sm:$0xff] %v823_v7  ;;  %v824_v11 = vadd.f32 %v811_v10, %v705_v6 }
 0x371   : > { %830 = vst [vmem:[#allocation3 + $0x18] sm:$0xff] %v826_v9 }
 0x372   : > { %828 = vst [vmem:[#allocation3 + $0x8] sm:$0xff] %v824_v11 }
 0x376   : > { %v837_v14 = vld [vmem:[#allocation3 + $0x10] sm:$0xff] }
 0x377   : > { %v835_v12 = vld [vmem:[#allocation3] sm:$0xff] }
 0x378   : > { %v838_v16 = vld [vmem:[#allocation3 + $0x18] sm:$0xff] }
 0x379   : > { %v836_v13 = vld [vmem:[#allocation3 + $0x8] sm:$0xff]  ;;  %v1032_v17 = vpack.c.bf16 %v838_v16, %v837_v14 }
 0x37a   : > { %v1027_v15 = vpack.c.bf16 %v836_v13, %v835_v12 }
 0x37b   : > { %1035 = vst [vmem:[%s1382_s19 + $0x8] sm:$0xff] %v1032_v17  }
 0x37c   : > { %1028 = vst [vmem:[%s1382_s19] sm:$0xff] %v1027_v15  }
 0x37d PF: > { %s17_s30 = sadd.s32 1, %s1246_s30   ;;  %s1459_s23 = sld [smem:[#allocation5_spill]] }
 0x37e   : > { %p14_p1 = scmp.ge.s32.totalorder %s17_s30, 18   ;;  %s1460_s15 = sld [smem:[#allocation6_spill]] }
 0x37f   : > { %s1461_s24 = smov %s1226_s25  ;;  %s1462_s25 = smov %s1337_s12 }
 0x380   : > { %s1463_s26 = smov %s1238_s28  ;;  %s1464_s27 = smov %s1242_s29 }
 0x381   :  { %16 = sbr.rel (!%p14_p1) target bundleno = 6 (0x6), region = 141 }
 0x383   : > { %s1465_s28 = smov %s1459_s23 }
 0x384   : > { %s1466_s29 = smov %s1460_s15 }

// kernel: clip_encode_image.9
= control target key start
LH: loop header
LB: loop body
LE: loop exit
PB: predicated region body
PF: predicated region fallthrough
CT: control target
= control target key end

     0   :  { %s1264_s24 = smov 0   ;;  %s1266_s25 = smov 0   ;;  %s1387_s0 = inlined_call_operand.vmem [shape: bf16[4,32,128], index: 0, kind: input, shape index: {}]   ;;  %s1388_s1 = inlined_call_operand.vmem [shape: f32[1,128], index: 1, kind: input, shape index: {}]   ;;  %s1389_s2 = inlined_call_operand.vmem [shape: f32[1,128], index: 2, kind: input, shape index: {}]   ;;  %s1390_s3 = inlined_call_operand.vmem [shape: bf16[4,128,96], index: 3, kind: input, shape index: {}]   ;;  %s1391_s4 = inlined_call_operand.vmem [shape: f32[4,1,96], index: 4, kind: input, shape index: {}]   ;;  %s1392_s5 = inlined_call_operand.vmem [shape: bf16[4,32,128], index: 5, kind: input, shape index: {}]   ;;  %s1393_s6 = inlined_call_operand.vmem [shape: f32[1,128], index: 6, kind: input, shape index: {}]   ;;  %s1394_s7 = inlined_call_operand.vmem [shape: bf16[4,32,128], index: 7, kind: output, shape index: {}]  }
   0x1   :  { %s1268_s26 = smov 0   ;;  %s1270_s27 = smov 0  }
   0x2   :  { %s1272_s28 = smov 0  }
   0x3 LB: > { %s26_s29 = sadd.s32 1, %s1211_s26  ;;  %s29_s30 = sadd.s32 1, %s1215_s27  ;;  %s1219_s28 = sphi %s1272_s28, %s17_s28   ;;  %s1215_s27 = sphi %s1270_s27, %s1400_s27   ;;  %s1211_s26 = sphi %s1268_s26, %s1399_s26   ;;  %s1207_s25 = sphi %s1266_s25, %s1398_s25   ;;  %s1203_s24 = sphi %s1264_s24, %s1397_s24  }
   0x4   : > { %p27_p0 = scmp.ge.s32.totalorder %s26_s29, 4  ;;  %p971_p1 = scmp.ge.s32.totalorder %s1219_s28, 1 }
   0x5   : > { %p277_p2 = scmp.lt.s32.totalorder %s1219_s28, 17 }
   0x6   : > { %s1402_s29 = smov (%p27_p0, %s26_s29), 0  ;;  %s1404_s30 = smov (!%p27_p0, %s29_s30), %s1215_s27 }
   0x7   : > { %p278_p3 = pnand %p971_p1, %p277_p2  ;;  %p31_p4 = scmp.ge.s32.totalorder %s1404_s30, 4 }
   0x8   : > { %p322_p5 = scmp.lt.s32.totalorder (!%p278_p3), %s1207_s25, 3  ;;  %p327_p6 = scmp.lt.s32.totalorder (!%p278_p3), %s1203_s24, 3 }
   0x9   : > { %s1406_s30 = smov (%p31_p4, %s1404_s30), 0  ;;  %281 = sbr.rel (%p278_p3) target bundleno = 1562 (0x61a), region = 48 }
   0xa   : > { %1395 = sst [smem:[#allocation4_spill]] %s1406_s30  ;;  %p980_p7 = scmp.ne.s32.totalorder (!%p278_p3), %s1203_s24, 0 }
  0x10   : > { %s1408_s25 = smov (!%p322_p5, %s1207_s25), 3  ;;  %349 = sbr.rel (%p980_p7) target bundleno = 345 (0x159), region = 52 }
  0x11   : > { %s1298_s8 = scalar_select %p327_p6, %s1203_s24, 3 }
  0x12   : > { %s1008_s9 = sshll.u32 %s1408_s25, 4  ;;  %v983_v1 = vld [vmem:[%s1393_s6] ss:$0 sm:$0xff] (!%p980_p7) }
  0x13   : > { %s326_s12 = scalar_lea.vmem %s1387_s0, %s1008_s9  ;;  %s1009_s13 = sshll.u32 %s1298_s8, 6  ;;  %v981_v41 = vld [vmem:[%s1388_s1] ss:$0 sm:$0xff] (!%p980_p7) }
  0x14   : > { %s1307_s16 = scalar_lea.vmem %s1390_s3, %s1009_s13  ;;  %s334_s19 = scalar_lea.vmem %s1391_s4, %s1298_s8  ;;  %v1017_v0 = vld [vmem:[%s326_s12] sm:$0xff] (!%p980_p7)   ;;  %v1034_v2 = vld [vmem:[%s326_s12 + $0x8] sm:$0xff] (!%p980_p7)  }
  0x15   : > { %s1010_s20 = sshll.u32 %s1298_s8, 4  ;;  %s1317_s23 = scalar_lea.vmem %s1394_s7, %s1008_s9  ;;  %v1018_v3 = vunpack.c.l.bf16 (!%p980_p7), %v1017_v0  ;;  %v1022_v4 = vunpack.c.l.bf16 (!%p980_p7), %v1034_v2  ;;  %v1019_v5 = vunpack.c.h.bf16 (!%p980_p7), %v1017_v0  ;;  %v1023_v6 = vunpack.c.h.bf16 (!%p980_p7), %v1034_v2  ;;  %v982_v46 = vld [vmem:[%s1389_s2] ss:$0 sm:$0xff] (!%p980_p7) }
  0x16   : > { %s1322_s10 = scalar_lea.vmem %s1392_s5, %s1010_s20 }
  0x17   : > { %360 = vadd.xlane.f32.xlu0 %v1018_v3  ;;  %v436_v7 = vadd.f32 %v1018_v3, %v983_v1  ;;  %364 = vadd.xlane.f32.xlu1 %v1022_v4  ;;  %v438_v8 = vadd.f32 %v1022_v4, %v983_v1  ;;  %v437_v9 = vadd.f32 %v1019_v5, %v983_v1 }
  0x18   : > { %v439_v10 = vadd.f32 %v1023_v6, %v983_v1 }
  0x19   : > { %440 = vst [vmem:[#allocation3] sm:$0xff] %v436_v7  ;;  %442 = vst [vmem:[#allocation3 + $0x10] sm:$0xff] %v438_v8 }
  0x1a   : > { %441 = vst [vmem:[#allocation3 + $0x8] sm:$0xff] %v437_v9  ;;  %443 = vst [vmem:[#allocation3 + $0x18] sm:$0xff] %v439_v10 }
  0x1b   : > { %362 = vadd.xlane.f32.xlu0 %v1019_v5  ;;  %366 = vadd.xlane.f32.xlu1 %v1023_v6 }
  0xa4   : > { %v361_v11 = vpop.xlane.xlu0 %360  ;;  %v365_v12 = vpop.xlane.xlu1 %364 }
  0xa5   : > { %v369_v13 = vmul.f32 0.0078125, %v361_v11  ;;  %v371_v14 = vmul.f32 0.0078125, %v365_v12 }
  0xa7   : > { %v373_v15 = vsub.f32 %v1018_v3, %v369_v13  ;;  %v375_v16 = vsub.f32 %v1022_v4, %v371_v14 }
  0xa8   : > { %v363_v17 = vpop.xlane.xlu0 %362  ;;  %v367_v18 = vpop.xlane.xlu1 %366 }
  0xa9   : > { %v370_v19 = vmul.f32 0.0078125, %v363_v17  ;;  %v377_v20 = vmul.f32 %v373_v15, %v373_v15  ;;  %v372_v21 = vmul.f32 0.0078125, %v367_v18  ;;  %v379_v24 = vmul.f32 %v375_v16, %v375_v16 }
  0xab   : > { %v374_v22 = vsub.f32 %v1019_v5, %v370_v19  ;;  %381 = vadd.xlane.f32.xlu0 %v377_v20  ;;  %v376_v23 = vsub.f32 %v1023_v6, %v372_v21 }
  0xad   : > { %v378_v25 = vmul.f32 %v374_v22, %v374_v22  ;;  %v380_v26 = vmul.f32 %v376_v23, %v376_v23 }
  0xaf   : > { %385 = vadd.xlane.f32.xlu0 %v379_v24  ;;  %383 = vadd.xlane.f32.xlu1 %v378_v25 }
  0xb3   : > { %387 = vadd.xlane.f32.xlu1 %v380_v26 }
 0x138   : > { %v382_v27 = vpop.xlane.xlu0 %381 }
 0x139   : > { %v389_v28 = vmul.f32 0.0078125, %v382_v27 }
 0x13b   : > { %v393_v29 = vadd.f32 1e-05, %v389_v28 }
 0x13c   : > { %v384_v30 = vpop.xlane.xlu1 %383  ;;  %v386_v31 = vpop.xlane.xlu0 %385 }
 0x13d   : > { %1147 = vrsqrt.f32 %v393_v29  ;;  %v390_v32 = vmul.f32 0.0078125, %v384_v30  ;;  %v391_v33 = vmul.f32 0.0078125, %v386_v31 }
 0x13f   : > { %v394_v34 = vadd.f32 1e-05, %v390_v32  ;;  %v395_v35 = vadd.f32 1e-05, %v391_v33 }
 0x140   : > { %v388_v36 = vpop.xlane.xlu1 %387 }
 0x141   : > { %1149 = vrsqrt.f32 %v394_v34  ;;  %v392_v37 = vmul.f32 0.0078125, %v388_v36 }
 0x142   : > { %1151 = vrsqrt.f32 %v395_v35 }
 0x143   : > { %v396_v38 = vadd.f32 1e-05, %v392_v37 }
 0x145   : > { %1153 = vrsqrt.f32 %v396_v38 }
 0x147   : > { %v1148_v39 = vpop.eup %1147 }
 0x148   : > { %v401_v40 = vmul.f32 %v1148_v39, %v373_v15 }
 0x14a   : > { %v411_v44 = vmul.f32 %v981_v41, %v401_v40 }
 0x14b   : > { %v1150_v42 = vpop.eup %1149 }
 0x14c   : > { %v1152_v43 = vpop.eup %1151  ;;  %v402_v45 = vmul.f32 %v1150_v42, %v374_v22  ;;  %v421_v50 = vadd.f32 %v982_v46, %v411_v44 }
 0x14d   : > { %v403_v47 = vmul.f32 %v1152_v43, %v375_v16 }
 0x14e   : > { %v412_v48 = vmul.f32 %v981_v41, %v402_v45 }
 0x14f   : > { %v1154_v49 = vpop.eup %1153  ;;  %v413_v52 = vmul.f32 %v981_v41, %v403_v47 }
 0x150   : > { %v422_v51 = vadd.f32 %v982_v46, %v412_v48  ;;  %v404_v53 = vmul.f32 %v1154_v49, %v376_v23 }
 0x151   : > { %v423_v56 = vadd.f32 %v982_v46, %v413_v52 }
 0x152   : > { %v425_v54 = vpack.c.bf16 %v422_v51, %v421_v50  ;;  %v414_v55 = vmul.f32 %v981_v41, %v404_v53 }
 0x154   : > { %427 = vst [vmem:[#allocation2] sm:$0xff] %v425_v54  ;;  %v424_v57 = vadd.f32 %v982_v46, %v414_v55 }
 0x156   : > { %v426_v58 = vpack.c.bf16 %v424_v57, %v423_v56 }
 0x158   : > { %428 = vst [vmem:[#allocation2 + $0x8] sm:$0xff] %v426_v58 }
 0x159 PF: > { %v1155_v59 = vld [vmem:[%s1307_s16] sm:$0xff]   ;;  %v1156_v60 = vld [vmem:[%s1307_s16 + $0x8] sm:$0xff]   ;;  %v1157_v61 = vld [vmem:[%s1307_s16 + $0x10] sm:$0xff]   ;;  %vm574_vm0 = vcmask 261120   ;;  %s1222_s18 = smov 96   ;;  %v636_v21 = vlaneseq  ;;  %p1001_p8 = scmp.ne.s32.totalorder %s1203_s24, 3 }
 0x15a   : > { %1058 = vmatprep.subr.bf16.mxu0 %v1155_v59  ;;  %v1158_v62 = vld [vmem:[%s1307_s16 + $0x18] sm:$0xff]   ;;  %v1159_v0 = vld [vmem:[%s1307_s16 + $0x20] sm:$0xff]   ;;  %v1160_v1 = vld [vmem:[%s1307_s16 + $0x28] sm:$0xff]   ;;  %v1223_v24 = vmov -1e+30  }
 0x15b   : > { %1059 = vmatpush3.bf16.msra.mxu0 %v1155_v59  ;;  %v444_v63 = vld [vmem:[#allocation2] sm:$0xff]  ;;  %v1161_v2 = vld [vmem:[%s1307_s16 + $0x30] sm:$0xff]   ;;  %v1162_v3 = vld [vmem:[%s1307_s16 + $0x38] sm:$0xff]   ;;  %s1221_s16 = smov 64   ;;  %v637_v22 = vand.u32 127, %v636_v21 }
 0x15c   : > { %1060 = vmatprep.subr.bf16.mxu0 %v1156_v60  ;;  %1074 = vmatprep.mubr.bf16.mxu0 %v444_v63  ;;  %v984_v6 = vld [vmem:[%s334_s19] ss:$0 sm:$0xff]  ;;  %v755_v21 = vld [vmem:[#allocation3] sm:$0xff] }
 0x15d   : > { %vm638_vm1 = vcmp.lt.s32.totalorder %v637_v22, 17 }
 0x15e   : > { %v639_v25 = vsel %vm638_vm1, 0.0, %v1223_v24 }
 0x15f   : > { %1061 = vmatpush3.bf16.msra.mxu0 %v1156_v60  ;;  %v445_v4 = vld [vmem:[#allocation2 + $0x8] sm:$0xff] }
 0x160   : > { %1062 = vmatprep.subr.bf16.mxu0 %v1157_v61 }
 0x163   : > { %1063 = vmatpush3.bf16.msra.mxu0 %v1157_v61 }
 0x164   : > { %1064 = vmatprep.subr.bf16.mxu0 %v1158_v62 }
 0x167   : > { %1065 = vmatpush3.bf16.msra.mxu0 %v1158_v62 }
 0x168   : > { %1066 = vmatprep.subr.bf16.mxu0 %v1159_v0 }
 0x16b   : > { %1067 = vmatpush3.bf16.msra.mxu0 %v1159_v0  ;;  %v1163_v0 = vld [vmem:[%s1322_s10] sm:$0xff]  }
 0x16c   : > { %1068 = vmatprep.subr.bf16.mxu0 %v1160_v1 }
 0x16f   : > { %1069 = vmatpush3.bf16.msra.mxu0 %v1160_v1  ;;  %v1164_v1 = vld [vmem:[%s1322_s10 + $0x8] sm:$0xff]  }
 0x170   : > { %1070 = vmatprep.subr.bf16.mxu0 %v1161_v2 }
 0x173   : > { %1071 = vmatpush3.bf16.msra.mxu0 %v1161_v2 }
 0x174   : > { %1072 = vmatprep.subr.bf16.mxu0 %v1162_v3 }
 0x177   : > { %1073 = vmatpush3.bf16.msra.mxu0 %v1162_v3 }
 0x17a   : > { %1075 = vmatmul.mubr.bf16.vlgmr.msra.gmra.mrb[0].mxu0 %v445_v4 }
 0x24d   : > { %v1076_v5 = vpop.f32.mrb[0].mxu0 }
 0x24e   : > { %v551_v7 = vpop.f32.mrb[1].mxu0  ;;  %v560_v9 = vadd.f32 %v1076_v5, %v984_v6 }
 0x24f   : > { %v1077_v8 = vpop.f32.mrb[2].mxu0  ;;  %v552_v12 = vadd.f32 %v984_v6, %v551_v7 }
 0x250   : > { %v563_v10 = vadd.f32 %v1077_v8, %v984_v6  ;;  %v554_v11 = vpop.f32.mrb[3].mxu0 }
 0x251   : > { %v555_v13 = vadd.f32 %v984_v6, %v554_v11 }
 0x252   : > { %v567_v14 = vpack.c.bf16 %v563_v10, %v560_v9 }
 0x253   : > { %v566_v15 = vpack.c.bf16 %v555_v13, %v552_v12 }
 0x255   : > { %686 = vrot.lane.b32.xlu1 %v566_v15, %s1221_s16  ;;  %570 = vrot.lane.b32.xlu0 %v566_v15, %s1222_s18 }
 0x256   : > { %1082 = vmatprep.mubr.msk.bf16.mxu1 %vm574_vm0, %v566_v15 }
 0x259   : > { %572 = vrot.lane.b32.xlu0 %v567_v14, %s1222_s18 }
 0x2c7   : > { %v571_v16 = vpop.permute.xlu0 %570  ;;  %v687_v20 = vpop.permute.xlu1 %686 }
 0x2c8   : > { %1102 = vmatprep.subr.msk.bf16.mxu1 %vm574_vm0, %v571_v16  ;;  %v582_v17 = vsel %vm574_vm0, %v571_v16, 0 }
 0x2c9   : > { %1079 = vmatpush3.bf16.xpose.msra.mxu1 %v582_v17 }
 0x2cb   : > { %v573_v18 = vpop.permute.xlu0 %572 }
 0x2cc   : > { %1103 = vmatprep.subr.msk.bf16.mxu1 %vm574_vm0, %v573_v18  ;;  %v585_v19 = vsel %vm574_vm0, %v573_v18, 0 }
 0x2d1   : > { %1081 = vmatpush3.bf16.xpose.msra.mxu1 %v585_v19 }
 0x2d2   : > { %1086 = vmatprep.subr.bf16.mxu1 %v687_v20 }
 0x2d8   : > { %1083 = vmatmul.mubr.msk.bf16.vlgmr.msra.gmra.mrb[0].mxu1 %vm574_vm0, %v567_v14 }
 0x2d9   : > { %1087 = vmatpush3.bf16.msra.mxu1 %v687_v20  ;;  %v757_v20 = vld [vmem:[#allocation3 + $0x10] sm:$0xff] }
 0x3ab   : > { %v1084_v23 = vpop.f32.mrb[0].mxu1 }
 0x3ac   : > { %v642_v26 = vmul.f32 0.17677669, %v1084_v23  ;;  %v621_v27 = vpop.f32.mrb[1].mxu1  ;;  %v758_v23 = vld [vmem:[#allocation3 + $0x18] sm:$0xff] }
 0x3ad   : > { %v640_v28 = vmul.f32 0.17677669, %v621_v27  ;;  %v1085_v29 = vpop.f32.mrb[2].mxu1 }
 0x3ae   : > { %v643_v30 = vmul.f32 0.17677669, %v1085_v29  ;;  %v624_v31 = vpop.f32.mrb[3].mxu1  ;;  %v646_v32 = vadd.f32 %v642_v26, %v639_v25  ;;  %v756_v26 = vld [vmem:[#allocation3 + $0x8] sm:$0xff] }
 0x3af   : > { %v644_v33 = vadd.f32 %v640_v28, %v639_v25  ;;  %v641_v35 = vmul.f32 0.17677669, %v624_v31 }
 0x3b0   : > { %v654_v34 = vsel %vm574_vm0, %v646_v32, -inf  ;;  %v647_v37 = vadd.f32 %v643_v30, %v639_v25 }
 0x3b1   : > { %655 = vmax.xlane.f32.xlu0 %v654_v34  ;;  %v648_v36 = vsel %vm574_vm0, %v644_v33, -inf  ;;  %v645_v39 = vadd.f32 %v641_v35, %v639_v25 }
 0x3b2   : > { %649 = vmax.xlane.f32.xlu1 %v648_v36  ;;  %v657_v38 = vsel %vm574_vm0, %v647_v37, -inf }
 0x3b3   : > { %v651_v40 = vsel %vm574_vm0, %v645_v39, -inf }
 0x3b6   : > { %658 = vmax.xlane.f32.xlu1 %v657_v38 }
 0x3ba   : > { %652 = vmax.xlane.f32.xlu1 %v651_v40 }
 0x3cb   : > { %688 = vrot.lane.b32.xlu1 %v567_v14, %s1221_s16 }
 0x43e   : > { %v656_v41 = vpop.xlane.xlu0 %655 }
 0x43f   : > { %v662_v42 = vsub.f32 %v646_v32, %v656_v41  ;;  %v650_v43 = vpop.xlane.xlu1 %649 }
 0x440   : > { %v660_v44 = vsub.f32 %v644_v33, %v650_v43 }
 0x441   : > { %v668_v45 = vmul.f32 1.442695, %v662_v42 }
 0x442   : > { %v664_v46 = vmul.f32 1.442695, %v660_v44 }
 0x443   : > { %1165 = vpow2.f32 %v668_v45  ;;  %v659_v47 = vpop.xlane.xlu1 %658 }
 0x444   : > { %1167 = vpow2.f32 %v664_v46  ;;  %v663_v48 = vsub.f32 %v647_v37, %v659_v47 }
 0x446   : > { %v670_v49 = vmul.f32 1.442695, %v663_v48 }
 0x447   : > { %v653_v50 = vpop.xlane.xlu1 %652 }
 0x448   : > { %v661_v51 = vsub.f32 %v645_v39, %v653_v50  ;;  %1169 = vpow2.f32 %v670_v49 }
 0x44a   : > { %v666_v52 = vmul.f32 1.442695, %v661_v51 }
 0x44b   : > { %v689_v53 = vpop.permute.xlu1 %688 }
 0x44c   : > { %1171 = vpow2.f32 %v666_v52  ;;  %1088 = vmatprep.subr.bf16.mxu1 %v689_v53 }
 0x44d   : > { %v1166_v54 = vpop.eup %1165  ;;  %1089 = vmatpush3.bf16.msra.mxu1 %v689_v53 }
 0x44e   : > { %v1168_v55 = vpop.eup %1167  ;;  %v678_v56 = vsel %vm574_vm0, %v1166_v54, 0.0  ;;  %1094 = vmatprep.subr.bf16.mxu1 %v1163_v0 }
 0x44f   : > { %679 = vadd.xlane.f32.xlu0 %v678_v56  ;;  %v672_v57 = vsel %vm574_vm0, %v1168_v55, 0.0 }
 0x450   : > { %673 = vadd.xlane.f32.xlu1 %v672_v57 }
 0x452   : > { %v1170_v58 = vpop.eup %1169 }
 0x453   : > { %v685_v62 = vpack.c.bf16 %v1170_v58, %v1166_v54  ;;  %v681_v63 = vsel %vm574_vm0, %v1170_v58, 0.0 }
 0x456   : > { %v1172_v59 = vpop.eup %1171 }
 0x457   : > { %v675_v60 = vsel %vm574_vm0, %v1172_v59, 0.0  ;;  %v684_v61 = vpack.c.bf16 %v1172_v59, %v1168_v55 }
 0x458   : > { %676 = vadd.xlane.f32.xlu0 %v675_v60 }
 0x459   : > { %1090 = vmatprep.mubr.msk.bf16.mxu1 %vm574_vm0, %v684_v61 }
 0x45a   : > { %1091 = vmatmul.mubr.msk.bf16.vlgmr.msra.gmra.mrb[4].mxu1 %vm574_vm0, %v685_v62 }
 0x45b   : > { %1095 = vmatpush3.bf16.msra.mxu1 %v1163_v0 }
 0x45c   : > { %682 = vadd.xlane.f32.xlu0 %v681_v63  ;;  %1096 = vmatprep.subr.bf16.mxu1 %v1164_v1 }
 0x45f   : > { %1097 = vmatpush3.bf16.msra.mxu1 %v1164_v1 }
 0x4dc   : > { %v680_v2 = vpop.xlane.xlu0 %679 }
 0x4dd   : > { %v674_v4 = vpop.xlane.xlu1 %673  ;;  %1173 = vrcp.f32 %v680_v2 }
 0x4de   : > { %1175 = vrcp.f32 %v674_v4 }
 0x4e5   : > { %v677_v3 = vpop.xlane.xlu0 %676 }
 0x4e7   : > { %v1174_v6 = vpop.eup %1173 }
 0x4e8   : > { %v1176_v8 = vpop.eup %1175 }
 0x4e9   : > { %v683_v5 = vpop.xlane.xlu0 %682 }
 0x4ea   : > { %1177 = vrcp.f32 %v683_v5 }
 0x4eb   : > { %1179 = vrcp.f32 %v677_v3 }
 0x4f4   : > { %v1178_v10 = vpop.eup %1177 }
 0x4f5   : > { %v1180_v12 = vpop.eup %1179 }
 0x52d   : > { %v1092_v7 = vpop.f32.mrb[4].mxu1 }
 0x52e   : > { %v732_v9 = vpop.f32.mrb[5].mxu1  ;;  %v753_v13 = vmul.f32 %v1174_v6, %v1092_v7 }
 0x52f   : > { %v1093_v11 = vpop.f32.mrb[6].mxu1  ;;  %v751_v16 = vmul.f32 %v1176_v8, %v732_v9 }
 0x530   : > { %v754_v14 = vmul.f32 %v1178_v10, %v1093_v11  ;;  %v735_v15 = vpop.f32.mrb[7].mxu1 }
 0x531   : > { %v752_v17 = vmul.f32 %v1180_v12, %v735_v15 }
 0x532   : > { %v760_v18 = vpack.c.bf16 %v754_v14, %v753_v13 }
 0x533   : > { %v759_v19 = vpack.c.bf16 %v752_v17, %v751_v16 }
 0x535   : > { %1098 = vmatprep.mubr.msk.bf16.mxu1 %vm574_vm0, %v759_v19 }
 0x536   : > { %1099 = vmatmul.mubr.msk.bf16.vlgmr.msra.gmra.mrb[8].mxu1 %vm574_vm0, %v760_v18 }
 0x609   : > { %v1100_v22 = vpop.f32.mrb[8].mxu1  ;;  %843 = sbr.rel (%p1001_p8) target bundleno = 1562 (0x61a), region = 56 }
 0x60a   : > { %v834_v24 = vadd.f32 %v1100_v22, %v757_v20  ;;  %v817_v25 = vpop.f32.mrb[9].mxu1 }
 0x60b   : > { %v832_v27 = vadd.f32 %v817_v25, %v755_v21  ;;  %v1101_v28 = vpop.f32.mrb[10].mxu1 }
 0x60c   : > { %838 = vst [vmem:[#allocation3 + $0x10] sm:$0xff] %v834_v24  ;;  %v835_v29 = vadd.f32 %v1101_v28, %v758_v23  ;;  %v820_v30 = vpop.f32.mrb[11].mxu1 }
 0x60d   : > { %836 = vst [vmem:[#allocation3] sm:$0xff] %v832_v27  ;;  %v833_v31 = vadd.f32 %v820_v30, %v756_v26 }
 0x60e   : > { %839 = vst [vmem:[#allocation3 + $0x18] sm:$0xff] %v835_v29 }
 0x60f   : > { %837 = vst [vmem:[#allocation3 + $0x8] sm:$0xff] %v833_v31 }
 0x613   : > { %v846_v34 = vld [vmem:[#allocation3 + $0x10] sm:$0xff] }
 0x614   : > { %v844_v32 = vld [vmem:[#allocation3] sm:$0xff] }
 0x615   : > { %v847_v36 = vld [vmem:[#allocation3 + $0x18] sm:$0xff] }
 0x616   : > { %v845_v33 = vld [vmem:[#allocation3 + $0x8] sm:$0xff]  ;;  %v1032_v37 = vpack.c.bf16 %v847_v36, %v846_v34 }
 0x617   : > { %v1027_v35 = vpack.c.bf16 %v845_v33, %v844_v32 }
 0x618   : > { %1035 = vst [vmem:[%s1317_s23 + $0x8] sm:$0xff] %v1032_v37  }
 0x619   : > { %1028 = vst [vmem:[%s1317_s23] sm:$0xff] %v1027_v35  }
 0x61a PF: > { %s17_s28 = sadd.s32 1, %s1219_s28   ;;  %s1396_s8 = sld [smem:[#allocation4_spill]] }
 0x61b   : > { %p14_p9 = scmp.ge.s32.totalorder %s17_s28, 18   ;;  %s1397_s24 = smov %s1211_s26 }
 0x61c   : > { %s1398_s25 = smov %s1215_s27  ;;  %s1399_s26 = smov %s1402_s29 }
 0x61d   :  { %16 = sbr.rel (!%p14_p9) target bundleno = 3 (0x3), region = 95 }
 0x620   : > { %s1400_s27 = smov %s1396_s8 }

// kernel: clip_encode_image.13
= control target key start
LH: loop header
LB: loop body
LE: loop exit
PB: predicated region body
PF: predicated region fallthrough
CT: control target
= control target key end

     0   :  { %vm23_vm0 = vcmask 1043456   ;;  %s323_s0 = inlined_call_operand.vmem [shape: bf16[4,128], index: 0, kind: input, shape index: {}]   ;;  %s324_s1 = inlined_call_operand.vmem [shape: f32[1,128], index: 1, kind: input, shape index: {}]   ;;  %s325_s2 = inlined_call_operand.vmem [shape: f32[1,128], index: 2, kind: input, shape index: {}]   ;;  %s326_s3 = inlined_call_operand.vmem [shape: bf16[128,128], index: 3, kind: input, shape index: {}]   ;;  %s327_s4 = inlined_call_operand.hbm [shape: f32[4,128], index: 4, kind: output, shape index: {}]  }
   0x1   :  { %v19_v0 = vld [vmem:[%s323_s0] sm:$0x3] }
   0x2   :  { %v20_v1 = vunpack.c.l.bf16 %v19_v0 }
   0x4   :  { %v24_v2 = vsel %vm23_vm0, %v20_v1, 0.0 }
   0x5   :  { %25 = vadd.xlane.f32.xlu0 %v24_v2 }
   0x6   :  { %9 = vsyncpa [#allocation3], 0  ;;  %v214_v3 = vld [vmem:[%s326_s3] sm:$0xff]   ;;  %v248_v4 = vmov 0.0   ;;  %v215_v5 = vld [vmem:[%s326_s3 + $0x8] sm:$0xff]   ;;  %vm249_vm1 = vmmov 0  }
   0x7   :  { %191 = vmatprep.subr.bf16.mxu0 %v248_v4  ;;  %v216_v11 = vld [vmem:[%s326_s3 + $0x10] sm:$0xff]   ;;  %v217_v12 = vld [vmem:[%s326_s3 + $0x18] sm:$0xff]   ;;  %v218_v13 = vld [vmem:[%s326_s3 + $0x20] sm:$0xff]   ;;  %207 = vmatprep.mubr.msk.bf16.mxu0 %vm249_vm1, %v248_v4 }
   0x8   :  { %192 = vmatpush3.bf16.msra.mxu0 %v214_v3  ;;  %v219_v14 = vld [vmem:[%s326_s3 + $0x28] sm:$0xff]   ;;  %v220_v15 = vld [vmem:[%s326_s3 + $0x30] sm:$0xff]   ;;  %v221_v16 = vld [vmem:[%s326_s3 + $0x38] sm:$0xff]   ;;  %s250_s3 = smov [#allocation2]  }
   0x9   :  { %193 = vmatprep.subr.bf16.mxu0 %v248_v4  ;;  %v172_v21 = vld [vmem:[%s324_s1] ss:$0 sm:$0xff]  ;;  %s164_s10 = sshll.u32 %s250_s3, 4  ;;  %s165_s10 = int_to_ptr.vmem [resolvable:$true] %s164_s10 }
   0xa   :  { %v173_v23 = vld [vmem:[%s325_s2] ss:$0 sm:$0xff]  ;;  %s224_s11 = scalar_lea.vmem %s165_s10, 64  ;;  %p229_p1 = scmp.lt.s32.totalorder %s165_s10, %s165_s10 }
   0xb   :  { %p225_p0 = scmp.ne.s32.totalorder %s165_s10, %s224_s11  ;;  %p230_p2 = scmp.lt.s32.totalorder %s224_s11, %s224_s11 }
   0xc   :  { %194 = vmatpush3.bf16.msra.mxu0 %v215_v5 }
   0xd   :  { %195 = vmatprep.subr.bf16.mxu0 %v248_v4  ;;  %p231_p3 = por %p230_p2, %p229_p1 }
   0xf   :  { %p232_p4 = pnand %p231_p3, %p225_p0 }
  0x10   :  { %196 = vmatpush3.bf16.msra.mxu0 %v216_v11 }
  0x11   :  { %197 = vmatprep.subr.bf16.mxu0 %v248_v4 }
  0x14   :  { %198 = vmatpush3.bf16.msra.mxu0 %v217_v12 }
  0x15   :  { %199 = vmatprep.subr.bf16.mxu0 %v248_v4 }
  0x18   :  { %200 = vmatpush3.bf16.msra.mxu0 %v218_v13 }
  0x19   :  { %201 = vmatprep.subr.bf16.mxu0 %v248_v4 }
  0x1c   :  { %202 = vmatpush3.bf16.msra.mxu0 %v219_v14 }
  0x1d   :  { %203 = vmatprep.subr.bf16.mxu0 %v248_v4 }
  0x20   :  { %204 = vmatpush3.bf16.msra.mxu0 %v220_v15 }
  0x21   :  { %205 = vmatprep.subr.bf16.mxu0 %v248_v4 }
  0x24   :  { %206 = vmatpush3.bf16.msra.mxu0 %v221_v16 }
  0x92   :  { %v26_v6 = vpop.xlane.xlu0 %25 }
  0x93   :  { %v28_v7 = vmul.f32 0.0078125, %v26_v6 }
  0x95   :  { %v29_v8 = vsub.f32 %v20_v1, %v28_v7 }
  0x97   :  { %v30_v9 = vmul.f32 %v29_v8, %v29_v8 }
  0x99   :  { %v31_v10 = vsel %vm23_vm0, %v30_v9, 0.0 }
  0x9a   :  { %32 = vadd.xlane.f32.xlu0 %v31_v10 }
 0x127   :  { %v33_v17 = vpop.xlane.xlu0 %32 }
 0x128   :  { %v34_v18 = vmul.f32 0.0078125, %v33_v17 }
 0x12a   :  { %v35_v19 = vadd.f32 1e-05, %v34_v18 }
 0x12c   :  { %222 = vrsqrt.f32 %v35_v19 }
 0x136   :  { %v223_v20 = vpop.eup %222 }
 0x137   :  { %v37_v22 = vmul.f32 %v223_v20, %v29_v8 }
 0x139   :  { %v44_v24 = vmul.f32 %v172_v21, %v37_v22 }
 0x13b   :  { %v51_v25 = vadd.f32 %v173_v23, %v44_v24 }
 0x13d   :  { %v52_v26 = vpack.c.bf16 %v51_v25, %v51_v25 }
 0x13f   :  { %208 = vmatmul.mubr.bf16.vlgmr.msra.gmra.mrb[0].mxu0 %v52_v26 }
 0x212   :  { %v151_v27 = vpop.f32.mrb[0].mxu0 }
 0x213   :  { %157 = vst [vmem:[#allocation2] sm:$0xf] %v151_v27  ;;  %v209_v28 = vpop.f32.mrb[1].mxu0 }
 0x214   :  { %v154_v29 = vpop.f32.mrb[2].mxu0 }
 0x215   :  { %235 = shalt.err (!%p232_p4)
}
 0x216   :  { %s236_s12 = scalar_lea.hbm %s327_s4, 64 }
 0x217   :  { %p237_p5 = scmp.ne.s32.totalorder %s327_s4, %s236_s12  ;;  %p240_p6 = scmp.lt.u32.totalorder %s236_s12, %s327_s4 }
 0x219   :  { %p242_p7 = pnand %p240_p6, %p237_p5 }
 0x21b   :  { %245 = shalt.err (!%p242_p7)
}
 0x21c   :  { %167 = dma.vmem_to_hbm [thread:$0]  %s165_s10, 64, %s327_s4, [#allocation3]   ;;  %v210_v30 = vpop.f32.mrb[3].mxu0 }
 0x21d   :  { %246 = dma.done.wait [#allocation3], 64  }
 0x21e   :  { %247 = vsyncadd [#allocation3], 4294967232 }
 0x21f   :  { %171 = vsyncpa [#allocation3], 1 }

</bundles_post_ra>
